<compile_context>
chip_gen: v7x
topology: tpu7x:2x2x1
jax: 0.10.0
libtpu: 0.0.40
codegen_flags: <defaults>
</compile_context>

<pallas_src>
import functools

import jax
import jax.numpy as jnp
from jax import lax
from jax.experimental import pallas as pl
from jax.experimental.pallas import tpu as pltpu

GATE_PAD = 128  # each GRU gate gets its own 128-lane group (vreg-aligned slices)


def _round_up(x, m):
    return ((x + m - 1) // m) * m


# ---------------------------------------------------------------------------
# Pallas kernels
# ---------------------------------------------------------------------------
def _conv_mm_kernel(p_ref, w_ref, b_ref, o_ref, *, relu):
    # o = relu(W @ P + b): W (O, K), P (K, tn) -> (O, tn), pixels on lanes.
    acc = jnp.dot(w_ref[...], p_ref[...], preferred_element_type=jnp.float32)
    acc = acc + b_ref[...]
    if relu:
        acc = jnp.maximum(acc, 0.0)
    o_ref[...] = acc.astype(o_ref.dtype)


def conv_matmul_pallas(patches_km, w_ok, b, *, relu):
    """out[o, m] = relu?(sum_k w[o, k] * patches[k, m] + b[o]); lane-dense output.

    Small M: single full-array block (no padding / no extra HBM pass).
    Large M: largest 256-multiple lane tile with <=12.5% padding waste.
    """
    K, M = patches_km.shape
    O, Kw = w_ok.shape
    assert K == Kw
    m128 = _round_up(M, 128)
    if m128 <= 2048:
        tn, m_pad = M, M                                  # one block, no pad
    else:
        for tn in (2048, 1024, 512, 256, 128):
            m_pad = _round_up(M, tn)
            if m_pad - M <= m_pad // 8:
                break
        if m_pad != M:
            patches_km = jnp.pad(patches_km, ((0, 0), (0, m_pad - M)))
    out = pl.pallas_call(
        functools.partial(_conv_mm_kernel, relu=relu),
        out_shape=jax.ShapeDtypeStruct((O, m_pad), jnp.float32),
        grid=(m_pad // tn,),
        in_specs=[
            pl.BlockSpec((K, tn), lambda i: (0, i)),
            pl.BlockSpec((O, K), lambda i: (0, 0)),
            pl.BlockSpec((O, 1), lambda i: (0, 0)),
        ],
        out_specs=pl.BlockSpec((O, tn), lambda i: (0, i)),
        compiler_params=pltpu.CompilerParams(
            dimension_semantics=("parallel",),
            vmem_limit_bytes=48 * 1024 * 1024),
    )(patches_km, w_ok, b.reshape(O, 1))
    return out[:, :M]


def _lin_gates_kernel(f_ref, wl_ref, bl_ref, wi_ref, bi_ref, o_ref):
    # gates = relu(feats @ Wl + bl) @ Wi_pad + bi_pad  (GRU input projection hoisted)
    x = jnp.dot(f_ref[...], wl_ref[...], preferred_element_type=jnp.float32)
    x = jnp.maximum(x + bl_ref[...], 0.0)
    g = jnp.dot(x, wi_ref[...], preferred_element_type=jnp.float32) + bi_ref[...]
    o_ref[...] = g.astype(o_ref.dtype)


def lin_gates_pallas(feats, lin_w, lin_b, w_ih_padT, b_ih_pad):
    """Returns (n, 3*GATE_PAD) gates, each gate lane-aligned to its 128-lane group."""
    n, feat = feats.shape
    dl = lin_w.shape[0]
    gcols = w_ih_padT.shape[1]
    tr = 256 if n >= 256 else _round_up(n, 8)             # row tiles -> v7x megacore
    n_pad = _round_up(n, tr)
    if n_pad != n:
        feats = jnp.pad(feats, ((0, n_pad - n), (0, 0)))
    out = pl.pallas_call(
        _lin_gates_kernel,
        out_shape=jax.ShapeDtypeStruct((n_pad, gcols), jnp.float32),
        grid=(n_pad // tr,),
        in_specs=[
            pl.BlockSpec((tr, feat), lambda i: (i, 0)),
            pl.BlockSpec((feat, dl), lambda i: (0, 0)),
            pl.BlockSpec((1, dl), lambda i: (0, 0)),
            pl.BlockSpec((dl, gcols), lambda i: (0, 0)),
            pl.BlockSpec((1, gcols), lambda i: (0, 0)),
        ],
        out_specs=pl.BlockSpec((tr, gcols), lambda i: (i, 0)),
        compiler_params=pltpu.CompilerParams(dimension_semantics=("parallel",)),
    )(feats, lin_w.T, lin_b.reshape(1, dl), w_ih_padT, b_ih_pad)
    return out[:n]


def _gru_head_kernel(g_ref, whh_ref, bhh_ref, h1w_ref, h1b_ref,
                     h2w_ref, h2b_ref, ow_ref, ob_ref, val_ref, hn_ref):
    T, TB, _ = g_ref.shape
    HP = whh_ref.shape[0]          # padded hidden width (=GATE_PAD)
    T_pad = val_ref.shape[1]

    def sigmoid(v):                # EUP tanh form: no VPU divide on the serial path
        return 0.5 * jnp.tanh(0.5 * v) + 0.5

    h = jnp.zeros((TB, HP), jnp.float32)
    vals = []
    # T is small & static -> fully unrolled Python loop (review item).
    # Weights are read from refs inside the step (no long-lived vreg pinning).
    # TODO(synk): for long sequences, chunk T over an 'arbitrary' grid axis with
    # h carried in VMEM scratch to bound VMEM on v7x (64 MiB).
    for t in range(T):
        gi = g_ref[t]                                               # (TB, 3*HP)
        gh = jnp.dot(h, whh_ref[...],
                     preferred_element_type=jnp.float32) + bhh_ref[...]
        r = sigmoid(gi[:, 0:HP] + gh[:, 0:HP])                      # vreg-aligned slices
        z = sigmoid(gi[:, HP:2 * HP] + gh[:, HP:2 * HP])
        n = jnp.tanh(gi[:, 2 * HP:] + r * gh[:, 2 * HP:])
        h = (1.0 - z) * n + z * h                                   # padded lanes stay 0
        # fused value head (hidden1 -> hidden2 -> output)
        h1 = jnp.maximum(
            jnp.dot(h, h1w_ref[...], preferred_element_type=jnp.float32)
            + h1b_ref[...], 0.0)
        h2 = jnp.maximum(
            jnp.dot(h1, h2w_ref[...], preferred_element_type=jnp.float32)
            + h2b_ref[...], 0.0)
        vals.append(jnp.sum(h2 * ow_ref[...], axis=-1, keepdims=True) + ob_ref[...])
    if T_pad > T:
        vals.append(jnp.zeros((TB, T_pad - T), jnp.float32))
    val_ref[...] = jnp.concatenate(vals, axis=1)                    # ONE lane-dense store
    hn_ref[...] = h


def gru_head_pallas(gates, whh_padT, bhh_pad, h1w_padT, h1_b, h2wT, h2_b,
                    out_w, out_b, dr):
    """gates: (T, B, 3*GATE_PAD). Returns values (T, B, 1) and hn (B, dr)."""
    T, B, gcols = gates.shape
    HP = gcols // 3
    n_h1 = h1w_padT.shape[1]
    n_h2 = h2wT.shape[1]
    T_pad = _round_up(T, 128)
    # Split the (embarrassingly parallel) batch across TensorCores when it can
    # give each core 8-row-aligned tiles (v7x megacore); otherwise one block.
    nb = 2 if (B >= 16 and B % 16 == 0) else 1
    tb = B // nb
    vals, hn = pl.pallas_call(
        _gru_head_kernel,
        out_shape=(jax.ShapeDtypeStruct((B, T_pad), jnp.float32),
                   jax.ShapeDtypeStruct((B, HP), jnp.float32)),
        grid=(nb,),
        in_specs=[
            pl.BlockSpec((T, tb, gcols), lambda i: (0, i, 0)),
            pl.BlockSpec((HP, gcols), lambda i: (0, 0)),
            pl.BlockSpec((1, gcols), lambda i: (0, 0)),
            pl.BlockSpec((HP, n_h1), lambda i: (0, 0)),
            pl.BlockSpec((1, n_h1), lambda i: (0, 0)),
            pl.BlockSpec((n_h1, n_h2), lambda i: (0, 0)),
            pl.BlockSpec((1, n_h2), lambda i: (0, 0)),
            pl.BlockSpec((1, n_h2), lambda i: (0, 0)),
            pl.BlockSpec((1, 1), lambda i: (0, 0)),
        ],
        out_specs=(pl.BlockSpec((tb, T_pad), lambda i: (i, 0)),
                   pl.BlockSpec((tb, HP), lambda i: (i, 0))),
        compiler_params=pltpu.CompilerParams(dimension_semantics=("parallel",)),
    )(gates, whh_padT, bhh_pad, h1w_padT, h1_b.reshape(1, -1),
      h2wT, h2_b.reshape(1, -1), out_w, out_b.reshape(1, 1))
    values = vals[:, :T].T.reshape(T, B, 1)
    return values, hn[:, :dr]


# ---------------------------------------------------------------------------
# Plain-JAX glue (pure data movement, no gathers)
# ---------------------------------------------------------------------------
def _extract_patches_cm(x, k, stride, pad):
    """x: (C, N, H, W) channel-first -> (C*k*k, N*oh*ow); feature order (c, kh, kw)."""
    # TODO(synk): fusing im2col into the conv kernel (raw activation via pl.ANY +
    # strided in-kernel reads) would cut the dominant HBM read ~4x at large batch.
    if pad:
        x = jnp.pad(x, ((0, 0), (0, 0), (pad, pad), (pad, pad)))
    c, n, h, w = x.shape
    oh = (h - k) // stride + 1
    ow = (w - k) // stride + 1
    slabs = []
    for i in range(k):
        hi = i + (oh - 1) * stride + 1
        for j in range(k):
            wj = j + (ow - 1) * stride + 1
            slabs.append(x[:, :, i:hi:stride, j:wj:stride])          # (c, n, oh, ow)
    p = jnp.stack(slabs, axis=1)                                     # (c, k*k, n, oh, ow)
    return p.reshape(c * k * k, n * oh * ow), oh, ow


def _pad_gate_cols(m, dr, hp=GATE_PAD):
    """(rows, 3*dr) -> (rows, 3*hp): gate g placed at lane offset g*hp, rest zero."""
    rows = m.shape[0]
    out = jnp.zeros((rows, 3 * hp), m.dtype)
    for g in range(3):
        out = out.at[:, g * hp:g * hp + dr].set(m[:, g * dr:(g + 1) * dr])
    return out


def _pad_rows(m, rows):
    return jnp.pad(m, ((0, rows - m.shape[0]), (0, 0)))


def _feat_dims(settings):
    s = settings['RGB_state_space'][0]
    w1 = (s - 8) // 4 + 1
    w2 = (w1 - 4 + 2) // 2 + 1
    wm = (w2 - 2) // 2 + 1
    return w1, w2, wm, wm * wm * settings['d2']


def init_params(key, settings):
    c, d1, d2 = settings['channels'], settings['d1'], settings['d2']
    dl, dr = settings['dl'], settings['dr']
    _, _, _, feat = _feat_dims(settings)
    ks = jax.random.split(key, 16)

    def u(k, shape, scale):
        return jax.random.uniform(k, shape, jnp.float32, -1.0, 1.0) * scale

    return dict(
        conv1_w=u(ks[0], (d1, c, 8, 8), 0.05), conv1_b=u(ks[1], (d1,), 0.05),
        conv2_w=u(ks[2], (d2, d1, 4, 4), 0.05), conv2_b=u(ks[3], (d2,), 0.05),
        lin_w=u(ks[4], (dl, feat), 0.05), lin_b=u(ks[5], (dl,), 0.05),
        gru_w_ih=u(ks[6], (3 * dr, dl), 0.1), gru_w_hh=u(ks[7], (3 * dr, dr), 0.1),
        gru_b_ih=u(ks[8], (3 * dr,), 0.1), gru_b_hh=u(ks[9], (3 * dr,), 0.1),
        h1_w=u(ks[10], (128, dr), 0.1), h1_b=u(ks[11], (128,), 0.1),
        h2_w=u(ks[12], (64, 128), 0.1), h2_b=u(ks[13], (64,), 0.1),
        out_w=u(ks[14], (1, 64), 0.1), out_b=u(ks[15], (1,), 0.1),
    )


def critic_impala_forward(params, rgb, settings):
    """rgb ~ input_data['RGBCamera'], shape (T, B, 3, 84, 84). Returns (values, hn)."""
    T = rgb.shape[0]
    d1, d2 = settings['d1'], settings['d2']
    dr = settings['dr']
    _, _, _, feat = _feat_dims(settings)

    imgs = rgb.reshape(-1, 3, 84, 84).astype(jnp.float32)
    n = imgs.shape[0]
    x0 = imgs.transpose(1, 0, 2, 3)                                  # (3, n, 84, 84)

    # conv1 (k=8, s=4, p=0) + ReLU: lane-dense (channels x pixels) Pallas matmul
    p1, oh1, ow1 = _extract_patches_cm(x0, 8, 4, 0)                  # (192, n*400)
    x1 = conv_matmul_pallas(p1, params['conv1_w'].reshape(d1, -1),
                            params['conv1_b'], relu=True)            # (d1, n*400)
    x1 = x1.reshape(d1, n, oh1, ow1)

    # conv2 (k=4, s=2, p=1) + ReLU
    p2, oh2, ow2 = _extract_patches_cm(x1, 4, 2, 1)                  # (d1*16, n*100)
    x2 = conv_matmul_pallas(p2, params['conv2_w'].reshape(d2, -1),
                            params['conv2_b'], relu=True)            # (d2, n*100)
    x2 = x2.reshape(d2, n, oh2, ow2)

    # 2x2/2 max-pool + NCHW flatten (ReLU fused into conv2: max(relu)==relu(max)).
    # TODO(synk): fuse pool+flatten into the conv2 kernel epilogue to avoid the
    # extra HBM round trips over the activation at production batch sizes.
    pooled = x2.reshape(d2, n, oh2 // 2, 2, ow2 // 2, 2).max(axis=(3, 5))
    feats = pooled.transpose(1, 0, 2, 3).reshape(n, feat)            # PyTorch NCHW flatten

    # Lane-align the GRU gate weights once (each gate -> its own 128-lane group).
    w_ih_padT = _pad_gate_cols(params['gru_w_ih'].T, dr)                       # (dl, 384)
    b_ih_pad = _pad_gate_cols(params['gru_b_ih'].reshape(1, -1), dr)           # (1, 384)
    whh_padT = _pad_rows(_pad_gate_cols(params['gru_w_hh'].T, dr), GATE_PAD)   # (128, 384)
    bhh_pad = _pad_gate_cols(params['gru_b_hh'].reshape(1, -1), dr)            # (1, 384)
    h1w_padT = _pad_rows(params['h1_w'].T, GATE_PAD)                           # (128, 128)

    # fused lin + GRU input projection (hoisted out of the recurrence)
    gates = lin_gates_pallas(feats, params['lin_w'], params['lin_b'],
                             w_ih_padT, b_ih_pad)                    # (n, 384)
    gates = gates.reshape(T, -1, 3 * GATE_PAD)

    # fused GRU recurrence + value head (single pallas_call, unrolled over time)
    values, hn = gru_head_pallas(gates, whh_padT, bhh_pad,
                                 h1w_padT, params['h1_b'],
                                 params['h2_w'].T, params['h2_b'],
                                 params['out_w'], params['out_b'], dr)
    return values, hn[None]


# ---------------------------------------------------------------------------
# Pure-JAX reference (for correctness check)
# ---------------------------------------------------------------------------
def reference_forward(params, rgb, settings):
    dl, dr = settings['dl'], settings['dr']
    T = rgb.shape[0]
    imgs = rgb.reshape(-1, 3, 84, 84).astype(jnp.float32)
    dn = ('NCHW', 'OIHW', 'NCHW')
    x1 = jax.nn.relu(lax.conv_general_dilated(
        imgs, params['conv1_w'], (4, 4), 'VALID', dimension_numbers=dn,
        precision=lax.Precision.HIGHEST) + params['conv1_b'][None, :, None, None])
    x2 = lax.conv_general_dilated(
        x1, params['conv2_w'], (2, 2), [(1, 1), (1, 1)], dimension_numbers=dn,
        precision=lax.Precision.HIGHEST) + params['conv2_b'][None, :, None, None]
    x2p = lax.reduce_window(x2, -jnp.inf, lax.max, (1, 1, 2, 2), (1, 1, 2, 2), 'VALID')
    x2p = jax.nn.relu(x2p)
    feats = x2p.reshape(x2p.shape[0], -1)
    x = jax.nn.relu(feats @ params['lin_w'].T + params['lin_b'])
    x_seq = x.reshape(T, -1, dl)

    w_ih, w_hh = params['gru_w_ih'], params['gru_w_hh']
    b_ih, b_hh = params['gru_b_ih'], params['gru_b_hh']

    def step(h, x_t):
        gi = x_t @ w_ih.T + b_ih
        gh = h @ w_hh.T + b_hh
        r = jax.nn.sigmoid(gi[:, :dr] + gh[:, :dr])
        z = jax.nn.sigmoid(gi[:, dr:2 * dr] + gh[:, dr:2 * dr])
        n = jnp.tanh(gi[:, 2 * dr:] + r * gh[:, 2 * dr:])
        h_new = (1.0 - z) * n + z * h
        return h_new, h_new

    h0 = jnp.zeros((x_seq.shape[1], dr), jnp.float32)
    hn, xgru = lax.scan(step, h0, x_seq)
    h1 = jax.nn.relu(xgru @ params['h1_w'].T + params['h1_b'])
    h2 = jax.nn.relu(h1 @ params['h2_w'].T + params['h2_b'])
    values = h2 @ params['out_w'].T + params['out_b']
    return values, hn[None]


if __name__ == "__main__":
    settings = dict(RGB_state_space=(84, 84), channels=3, d1=8, d2=16, dl=32, dr=32)
    key = jax.random.PRNGKey(0)
    pkey, xkey = jax.random.split(key)
    params = init_params(pkey, settings)

    # RGBCamera shape is hardcoded to (..., 3, 84, 84) by the module's reshape;
    # keep T (seq) and B (batch) small.
    T, B = 2, 2
    rgb = jax.random.normal(xkey, (T, B, 3, 84, 84), jnp.float32)

    fwd = jax.jit(functools.partial(critic_impala_forward, settings=settings))
    values, hn = fwd(params, rgb)
    jax.block_until_ready((values, hn))

    with jax.default_matmul_precision('float32'):
        v_ref, h_ref = reference_forward(params, rgb, settings)

    assert values.shape == (T, B, 1) and hn.shape == (1, B, settings['dr'])
    assert jnp.allclose(values, v_ref, atol=2e-3, rtol=2e-3), \
        float(jnp.max(jnp.abs(values - v_ref)))
    assert jnp.allclose(hn, h_ref, atol=2e-3, rtol=2e-3), \
        float(jnp.max(jnp.abs(hn - h_ref)))
    print("KERNEL_OK")
</pallas_src>

<mosaic_0001>
module attributes {stable_mosaic.version = 11 : i64} {
  func.func @_conv_mm_kernel(%arg0: i32, %arg1: memref<192x1600xf32, #tpu.memory_space<vmem>>, %arg2: memref<8x192xf32, #tpu.memory_space<vmem>>, %arg3: memref<8x1xf32, #tpu.memory_space<vmem>>, %arg4: memref<8x1600xf32, #tpu.memory_space<vmem>>) attributes {dimension_semantics = [#tpu.dimension_semantics<parallel>], iteration_bounds = array<i64: 1>, scalar_prefetch = 0 : i64, scratch_operands = 0 : i64, tpu.core_type = #tpu.core_type<tc>, window_params = [{transform_indices = @transform_0, window_bounds = array<i64: 192, 1600>}, {pipeline_mode = #tpu.pipeline_mode<synchronous>, transform_indices = @transform_1, window_bounds = array<i64: 8, 192>}, {pipeline_mode = #tpu.pipeline_mode<synchronous>, transform_indices = @transform_2, window_bounds = array<i64: 8, 1>}, {transform_indices = @transform_3, window_bounds = array<i64: 8, 1600>}]} {
    %c0 = arith.constant 0 : index
    %c0_0 = arith.constant 0 : index
    %0 = vector.load %arg2[%c0, %c0_0] : memref<8x192xf32, #tpu.memory_space<vmem>>, vector<8x192xf32>
    %c0_1 = arith.constant 0 : index
    %c0_2 = arith.constant 0 : index
    %1 = vector.load %arg1[%c0_1, %c0_2] : memref<192x1600xf32, #tpu.memory_space<vmem>>, vector<192x1600xf32>
    %cst = arith.constant dense<0.000000e+00> : vector<8x1600xf32>
    %2 = tpu.matmul %0, %1, %cst {dimension_numbers = #tpu.dot_dimension_numbers<[1], [0], [0], [1], [0, 0, 1, 1], [], []>} : vector<8x192xf32>, vector<192x1600xf32>, vector<8x1600xf32> -> vector<8x1600xf32>
    %c0_3 = arith.constant 0 : index
    %c0_4 = arith.constant 0 : index
    %3 = vector.load %arg3[%c0_3, %c0_4] : memref<8x1xf32, #tpu.memory_space<vmem>>, vector<8x1xf32>
    %4 = vector.broadcast %3 : vector<8x1xf32> to vector<8x1600xf32>
    %5 = arith.addf %2, %4 : vector<8x1600xf32>
    %cst_5 = arith.constant 0.000000e+00 : f32
    %6 = vector.broadcast %cst_5 : f32 to vector<8x1600xf32>
    %7 = arith.maximumf %5, %6 : vector<8x1600xf32>
    %c0_6 = arith.constant 0 : index
    %c0_7 = arith.constant 0 : index
    %8 = vector.load %arg4[%c0_6, %c0_7] : memref<8x1600xf32, #tpu.memory_space<vmem>>, vector<8x1600xf32>
    tpu.vector_store %arg4[%c0_6, %c0_7], %7 {strides = array<i32>} : memref<8x1600xf32, #tpu.memory_space<vmem>>, vector<8x1600xf32>,
    return
  }
  func.func @transform_0(%arg0: i32) -> (i32, i32) {
    %c0_i32 = arith.constant 0 : i32
    %c0_i32_0 = arith.constant 0 : i32
    return %c0_i32, %arg0 : i32, i32
  }
  func.func @transform_1(%arg0: i32) -> (i32, i32) {
    %c0_i32 = arith.constant 0 : i32
    %c0_i32_0 = arith.constant 0 : i32
    %c0_i32_1 = arith.constant 0 : i32
    return %c0_i32, %c0_i32_0 : i32, i32
  }
  func.func @transform_2(%arg0: i32) -> (i32, i32) {
    %c0_i32 = arith.constant 0 : i32
    %c0_i32_0 = arith.constant 0 : i32
    %c0_i32_1 = arith.constant 0 : i32
    return %c0_i32, %c0_i32_0 : i32, i32
  }
  func.func @transform_3(%arg0: i32) -> (i32, i32) {
    %c0_i32 = arith.constant 0 : i32
    %c0_i32_0 = arith.constant 0 : i32
    return %c0_i32, %arg0 : i32, i32
  }
}

module attributes {stable_mosaic.version = 11 : i64} {
  func.func @_conv_mm_kernel(%arg0: i32, %arg1: memref<128x400xf32, #tpu.memory_space<vmem>>, %arg2: memref<16x128xf32, #tpu.memory_space<vmem>>, %arg3: memref<16x1xf32, #tpu.memory_space<vmem>>, %arg4: memref<16x400xf32, #tpu.memory_space<vmem>>) attributes {dimension_semantics = [#tpu.dimension_semantics<parallel>], iteration_bounds = array<i64: 1>, scalar_prefetch = 0 : i64, scratch_operands = 0 : i64, tpu.core_type = #tpu.core_type<tc>, window_params = [{transform_indices = @transform_0, window_bounds = array<i64: 128, 400>}, {pipeline_mode = #tpu.pipeline_mode<synchronous>, transform_indices = @transform_1, window_bounds = array<i64: 16, 128>}, {pipeline_mode = #tpu.pipeline_mode<synchronous>, transform_indices = @transform_2, window_bounds = array<i64: 16, 1>}, {transform_indices = @transform_3, window_bounds = array<i64: 16, 400>}]} {
    %c0 = arith.constant 0 : index
    %c0_0 = arith.constant 0 : index
    %0 = vector.load %arg2[%c0, %c0_0] : memref<16x128xf32, #tpu.memory_space<vmem>>, vector<16x128xf32>
    %c0_1 = arith.constant 0 : index
    %c0_2 = arith.constant 0 : index
    %1 = vector.load %arg1[%c0_1, %c0_2] : memref<128x400xf32, #tpu.memory_space<vmem>>, vector<128x400xf32>
    %cst = arith.constant dense<0.000000e+00> : vector<16x400xf32>
    %2 = tpu.matmul %0, %1, %cst {dimension_numbers = #tpu.dot_dimension_numbers<[1], [0], [0], [1], [0, 0, 1, 1], [], []>} : vector<16x128xf32>, vector<128x400xf32>, vector<16x400xf32> -> vector<16x400xf32>
    %c0_3 = arith.constant 0 : index
    %c0_4 = arith.constant 0 : index
    %3 = vector.load %arg3[%c0_3, %c0_4] : memref<16x1xf32, #tpu.memory_space<vmem>>, vector<16x1xf32>
    %4 = vector.broadcast %3 : vector<16x1xf32> to vector<16x400xf32>
    %5 = arith.addf %2, %4 : vector<16x400xf32>
    %cst_5 = arith.constant 0.000000e+00 : f32
    %6 = vector.broadcast %cst_5 : f32 to vector<16x400xf32>
    %7 = arith.maximumf %5, %6 : vector<16x400xf32>
    %c0_6 = arith.constant 0 : index
    %c0_7 = arith.constant 0 : index
    %8 = vector.load %arg4[%c0_6, %c0_7] : memref<16x400xf32, #tpu.memory_space<vmem>>, vector<16x400xf32>
    tpu.vector_store %arg4[%c0_6, %c0_7], %7 {strides = array<i32>} : memref<16x400xf32, #tpu.memory_space<vmem>>, vector<16x400xf32>,
    return
  }
  func.func @transform_0(%arg0: i32) -> (i32, i32) {
    %c0_i32 = arith.constant 0 : i32
    %c0_i32_0 = arith.constant 0 : i32
    return %c0_i32, %arg0 : i32, i32
  }
  func.func @transform_1(%arg0: i32) -> (i32, i32) {
    %c0_i32 = arith.constant 0 : i32
    %c0_i32_0 = arith.constant 0 : i32
    %c0_i32_1 = arith.constant 0 : i32
    return %c0_i32, %c0_i32_0 : i32, i32
  }
  func.func @transform_2(%arg0: i32) -> (i32, i32) {
    %c0_i32 = arith.constant 0 : i32
    %c0_i32_0 = arith.constant 0 : i32
    %c0_i32_1 = arith.constant 0 : i32
    return %c0_i32, %c0_i32_0 : i32, i32
  }
  func.func @transform_3(%arg0: i32) -> (i32, i32) {
    %c0_i32 = arith.constant 0 : i32
    %c0_i32_0 = arith.constant 0 : i32
    return %c0_i32, %arg0 : i32, i32
  }
}

module attributes {stable_mosaic.version = 11 : i64} {
  func.func @_lin_gates_kernel(%arg0: i32, %arg1: memref<8x400xf32, #tpu.memory_space<vmem>>, %arg2: memref<400x32xf32, #tpu.memory_space<vmem>>, %arg3: memref<1x32xf32, #tpu.memory_space<vmem>>, %arg4: memref<32x384xf32, #tpu.memory_space<vmem>>, %arg5: memref<1x384xf32, #tpu.memory_space<vmem>>, %arg6: memref<8x384xf32, #tpu.memory_space<vmem>>) attributes {dimension_semantics = [#tpu.dimension_semantics<parallel>], iteration_bounds = array<i64: 1>, scalar_prefetch = 0 : i64, scratch_operands = 0 : i64, tpu.core_type = #tpu.core_type<tc>, window_params = [{transform_indices = @transform_0, window_bounds = array<i64: 8, 400>}, {pipeline_mode = #tpu.pipeline_mode<synchronous>, transform_indices = @transform_1, window_bounds = array<i64: 400, 32>}, {pipeline_mode = #tpu.pipeline_mode<synchronous>, transform_indices = @transform_2, window_bounds = array<i64: 1, 32>}, {pipeline_mode = #tpu.pipeline_mode<synchronous>, transform_indices = @transform_3, window_bounds = array<i64: 32, 384>}, {pipeline_mode = #tpu.pipeline_mode<synchronous>, transform_indices = @transform_4, window_bounds = array<i64: 1, 384>}, {transform_indices = @transform_5, window_bounds = array<i64: 8, 384>}]} {
    %c0 = arith.constant 0 : index
    %c0_0 = arith.constant 0 : index
    %0 = vector.load %arg1[%c0, %c0_0] : memref<8x400xf32, #tpu.memory_space<vmem>>, vector<8x400xf32>
    %c0_1 = arith.constant 0 : index
    %c0_2 = arith.constant 0 : index
    %1 = vector.load %arg2[%c0_1, %c0_2] : memref<400x32xf32, #tpu.memory_space<vmem>>, vector<400x32xf32>
    %cst = arith.constant dense<0.000000e+00> : vector<8x32xf32>
    %2 = tpu.matmul %0, %1, %cst {dimension_numbers = #tpu.dot_dimension_numbers<[1], [0], [0], [1], [0, 0, 1, 1], [], []>} : vector<8x400xf32>, vector<400x32xf32>, vector<8x32xf32> -> vector<8x32xf32>
    %c0_3 = arith.constant 0 : index
    %c0_4 = arith.constant 0 : index
    %3 = vector.load %arg3[%c0_3, %c0_4] : memref<1x32xf32, #tpu.memory_space<vmem>>, vector<1x32xf32>
    %4 = vector.broadcast %3 : vector<1x32xf32> to vector<8x32xf32>
    %5 = arith.addf %2, %4 : vector<8x32xf32>
    %cst_5 = arith.constant 0.000000e+00 : f32
    %6 = vector.broadcast %cst_5 : f32 to vector<8x32xf32>
    %7 = arith.maximumf %5, %6 : vector<8x32xf32>
    %c0_6 = arith.constant 0 : index
    %c0_7 = arith.constant 0 : index
    %8 = vector.load %arg4[%c0_6, %c0_7] : memref<32x384xf32, #tpu.memory_space<vmem>>, vector<32x384xf32>
    %cst_8 = arith.constant dense<0.000000e+00> : vector<8x384xf32>
    %9 = tpu.matmul %7, %8, %cst_8 {dimension_numbers = #tpu.dot_dimension_numbers<[1], [0], [0], [1], [0, 0, 1, 1], [], []>} : vector<8x32xf32>, vector<32x384xf32>, vector<8x384xf32> -> vector<8x384xf32>
    %c0_9 = arith.constant 0 : index
    %c0_10 = arith.constant 0 : index
    %10 = vector.load %arg5[%c0_9, %c0_10] : memref<1x384xf32, #tpu.memory_space<vmem>>, vector<1x384xf32>
    %11 = vector.broadcast %10 : vector<1x384xf32> to vector<8x384xf32>
    %12 = arith.addf %9, %11 : vector<8x384xf32>
    %c0_11 = arith.constant 0 : index
    %c0_12 = arith.constant 0 : index
    %13 = vector.load %arg6[%c0_11, %c0_12] : memref<8x384xf32, #tpu.memory_space<vmem>>, vector<8x384xf32>
    tpu.vector_store %arg6[%c0_11, %c0_12], %12 {strides = array<i32>} : memref<8x384xf32, #tpu.memory_space<vmem>>, vector<8x384xf32>,
    return
  }
  func.func @transform_0(%arg0: i32) -> (i32, i32) {
    %c0_i32 = arith.constant 0 : i32
    %c0_i32_0 = arith.constant 0 : i32
    return %arg0, %c0_i32 : i32, i32
  }
  func.func @transform_1(%arg0: i32) -> (i32, i32) {
    %c0_i32 = arith.constant 0 : i32
    %c0_i32_0 = arith.constant 0 : i32
    %c0_i32_1 = arith.constant 0 : i32
    return %c0_i32, %c0_i32_0 : i32, i32
  }
  func.func @transform_2(%arg0: i32) -> (i32, i32) {
    %c0_i32 = arith.constant 0 : i32
    %c0_i32_0 = arith.constant 0 : i32
    %c0_i32_1 = arith.constant 0 : i32
    return %c0_i32, %c0_i32_0 : i32, i32
  }
  func.func @transform_3(%arg0: i32) -> (i32, i32) {
    %c0_i32 = arith.constant 0 : i32
    %c0_i32_0 = arith.constant 0 : i32
    %c0_i32_1 = arith.constant 0 : i32
    return %c0_i32, %c0_i32_0 : i32, i32
  }
  func.func @transform_4(%arg0: i32) -> (i32, i32) {
    %c0_i32 = arith.constant 0 : i32
    %c0_i32_0 = arith.constant 0 : i32
    %c0_i32_1 = arith.constant 0 : i32
    return %c0_i32, %c0_i32_0 : i32, i32
  }
  func.func @transform_5(%arg0: i32) -> (i32, i32) {
    %c0_i32 = arith.constant 0 : i32
    %c0_i32_0 = arith.constant 0 : i32
    return %arg0, %c0_i32 : i32, i32
  }
}

module attributes {stable_mosaic.version = 11 : i64} {
  func.func @_gru_head_kernel(%arg0: i32, %arg1: memref<2x2x384xf32, #tpu.memory_space<vmem>>, %arg2: memref<128x384xf32, #tpu.memory_space<vmem>>, %arg3: memref<1x384xf32, #tpu.memory_space<vmem>>, %arg4: memref<128x128xf32, #tpu.memory_space<vmem>>, %arg5: memref<1x128xf32, #tpu.memory_space<vmem>>, %arg6: memref<128x64xf32, #tpu.memory_space<vmem>>, %arg7: memref<1x64xf32, #tpu.memory_space<vmem>>, %arg8: memref<1x64xf32, #tpu.memory_space<vmem>>, %arg9: memref<1x1xf32, #tpu.memory_space<vmem>>, %arg10: memref<2x128xf32, #tpu.memory_space<vmem>>, %arg11: memref<2x128xf32, #tpu.memory_space<vmem>>) attributes {dimension_semantics = [#tpu.dimension_semantics<parallel>], iteration_bounds = array<i64: 1>, scalar_prefetch = 0 : i64, scratch_operands = 0 : i64, tpu.core_type = #tpu.core_type<tc>, window_params = [{transform_indices = @transform_0, window_bounds = array<i64: 2, 2, 384>}, {pipeline_mode = #tpu.pipeline_mode<synchronous>, transform_indices = @transform_1, window_bounds = array<i64: 128, 384>}, {pipeline_mode = #tpu.pipeline_mode<synchronous>, transform_indices = @transform_2, window_bounds = array<i64: 1, 384>}, {pipeline_mode = #tpu.pipeline_mode<synchronous>, transform_indices = @transform_3, window_bounds = array<i64: 128, 128>}, {pipeline_mode = #tpu.pipeline_mode<synchronous>, transform_indices = @transform_4, window_bounds = array<i64: 1, 128>}, {pipeline_mode = #tpu.pipeline_mode<synchronous>, transform_indices = @transform_5, window_bounds = array<i64: 128, 64>}, {pipeline_mode = #tpu.pipeline_mode<synchronous>, transform_indices = @transform_6, window_bounds = array<i64: 1, 64>}, {pipeline_mode = #tpu.pipeline_mode<synchronous>, transform_indices = @transform_7, window_bounds = array<i64: 1, 64>}, {pipeline_mode = #tpu.pipeline_mode<synchronous>, transform_indices = @transform_8, window_bounds = array<i64: 1, 1>}, {transform_indices = @transform_9, window_bounds = array<i64: 2, 128>}, {transform_indices = @transform_10, window_bounds = array<i64: 2, 128>}]} {
    %cst = arith.constant 0.000000e+00 : f32
    %0 = vector.broadcast %cst : f32 to vector<2x128xf32>
    %c0 = arith.constant 0 : index
    %c0_0 = arith.constant 0 : index
    %c0_1 = arith.constant 0 : index
    %1 = vector.load %arg1[%c0, %c0_0, %c0_1] : memref<2x2x384xf32, #tpu.memory_space<vmem>>, vector<1x2x384xf32>
    %2 = vector.shape_cast %1 : vector<1x2x384xf32> to vector<2x384xf32>
    %c0_2 = arith.constant 0 : index
    %c0_3 = arith.constant 0 : index
    %3 = vector.load %arg2[%c0_2, %c0_3] : memref<128x384xf32, #tpu.memory_space<vmem>>, vector<128x384xf32>
    %cst_4 = arith.constant dense<0.000000e+00> : vector<2x384xf32>
    %4 = tpu.matmul %0, %3, %cst_4 {dimension_numbers = #tpu.dot_dimension_numbers<[1], [0], [0], [1], [0, 0, 1, 1], [], []>} : vector<2x128xf32>, vector<128x384xf32>, vector<2x384xf32> -> vector<2x384xf32>
    %c0_5 = arith.constant 0 : index
    %c0_6 = arith.constant 0 : index
    %5 = vector.load %arg3[%c0_5, %c0_6] : memref<1x384xf32, #tpu.memory_space<vmem>>, vector<1x384xf32>
    %6 = vector.broadcast %5 : vector<1x384xf32> to vector<2x384xf32>
    %7 = arith.addf %4, %6 : vector<2x384xf32>
    %8 = vector.extract_strided_slice %2 {offsets = [0, 0], sizes = [2, 128], strides = [1, 1]} : vector<2x384xf32> to vector<2x128xf32>
    %9 = vector.extract_strided_slice %7 {offsets = [0, 0], sizes = [2, 128], strides = [1, 1]} : vector<2x384xf32> to vector<2x128xf32>
    %10 = arith.addf %8, %9 : vector<2x128xf32>
    %cst_7 = arith.constant 5.000000e-01 : f32
    %11 = vector.broadcast %cst_7 : f32 to vector<2x128xf32>
    %12 = arith.mulf %11, %10 : vector<2x128xf32>
    %13 = math.tanh %12 : vector<2x128xf32>
    %cst_8 = arith.constant 5.000000e-01 : f32
    %14 = vector.broadcast %cst_8 : f32 to vector<2x128xf32>
    %15 = arith.mulf %14, %13 : vector<2x128xf32>
    %cst_9 = arith.constant 5.000000e-01 : f32
    %16 = vector.broadcast %cst_9 : f32 to vector<2x128xf32>
    %17 = arith.addf %15, %16 : vector<2x128xf32>
    %18 = vector.extract_strided_slice %2 {offsets = [0, 128], sizes = [2, 128], strides = [1, 1]} : vector<2x384xf32> to vector<2x128xf32>
    %19 = vector.extract_strided_slice %7 {offsets = [0, 128], sizes = [2, 128], strides = [1, 1]} : vector<2x384xf32> to vector<2x128xf32>
    %20 = arith.addf %18, %19 : vector<2x128xf32>
    %cst_10 = arith.constant 5.000000e-01 : f32
    %21 = vector.broadcast %cst_10 : f32 to vector<2x128xf32>
    %22 = arith.mulf %21, %20 : vector<2x128xf32>
    %23 = math.tanh %22 : vector<2x128xf32>
    %cst_11 = arith.constant 5.000000e-01 : f32
    %24 = vector.broadcast %cst_11 : f32 to vector<2x128xf32>
    %25 = arith.mulf %24, %23 : vector<2x128xf32>
    %cst_12 = arith.constant 5.000000e-01 : f32
    %26 = vector.broadcast %cst_12 : f32 to vector<2x128xf32>
    %27 = arith.addf %25, %26 : vector<2x128xf32>
    %28 = vector.extract_strided_slice %2 {offsets = [0, 256], sizes = [2, 128], strides = [1, 1]} : vector<2x384xf32> to vector<2x128xf32>
    %29 = vector.extract_strided_slice %7 {offsets = [0, 256], sizes = [2, 128], strides = [1, 1]} : vector<2x384xf32> to vector<2x128xf32>
    %30 = arith.mulf %17, %29 : vector<2x128xf32>
    %31 = arith.addf %28, %30 : vector<2x128xf32>
    %32 = math.tanh %31 : vector<2x128xf32>
    %cst_13 = arith.constant 1.000000e+00 : f32
    %33 = vector.broadcast %cst_13 : f32 to vector<2x128xf32>
    %34 = arith.subf %33, %27 : vector<2x128xf32>
    %35 = arith.mulf %34, %32 : vector<2x128xf32>
    %36 = arith.mulf %27, %0 : vector<2x128xf32>
    %37 = arith.addf %35, %36 : vector<2x128xf32>
    %c0_14 = arith.constant 0 : index
    %c0_15 = arith.constant 0 : index
    %38 = vector.load %arg4[%c0_14, %c0_15] : memref<128x128xf32, #tpu.memory_space<vmem>>, vector<128x128xf32>
    %cst_16 = arith.constant dense<0.000000e+00> : vector<2x128xf32>
    %39 = tpu.matmul %37, %38, %cst_16 {dimension_numbers = #tpu.dot_dimension_numbers<[1], [0], [0], [1], [0, 0, 1, 1], [], []>} : vector<2x128xf32>, vector<128x128xf32>, vector<2x128xf32> -> vector<2x128xf32>
    %c0_17 = arith.constant 0 : index
    %c0_18 = arith.constant 0 : index
    %40 = vector.load %arg5[%c0_17, %c0_18] : memref<1x128xf32, #tpu.memory_space<vmem>>, vector<1x128xf32>
    %41 = vector.broadcast %40 : vector<1x128xf32> to vector<2x128xf32>
    %42 = arith.addf %39, %41 : vector<2x128xf32>
    %cst_19 = arith.constant 0.000000e+00 : f32
    %43 = vector.broadcast %cst_19 : f32 to vector<2x128xf32>
    %44 = arith.maximumf %42, %43 : vector<2x128xf32>
    %c0_20 = arith.constant 0 : index
    %c0_21 = arith.constant 0 : index
    %45 = vector.load %arg6[%c0_20, %c0_21] : memref<128x64xf32, #tpu.memory_space<vmem>>, vector<128x64xf32>
    %cst_22 = arith.constant dense<0.000000e+00> : vector<2x64xf32>
    %46 = tpu.matmul %44, %45, %cst_22 {dimension_numbers = #tpu.dot_dimension_numbers<[1], [0], [0], [1], [0, 0, 1, 1], [], []>} : vector<2x128xf32>, vector<128x64xf32>, vector<2x64xf32> -> vector<2x64xf32>
    %c0_23 = arith.constant 0 : index
    %c0_24 = arith.constant 0 : index
    %47 = vector.load %arg7[%c0_23, %c0_24] : memref<1x64xf32, #tpu.memory_space<vmem>>, vector<1x64xf32>
    %48 = vector.broadcast %47 : vector<1x64xf32> to vector<2x64xf32>
    %49 = arith.addf %46, %48 : vector<2x64xf32>
    %cst_25 = arith.constant 0.000000e+00 : f32
    %50 = vector.broadcast %cst_25 : f32 to vector<2x64xf32>
    %51 = arith.maximumf %49, %50 : vector<2x64xf32>
    %c0_26 = arith.constant 0 : index
    %c0_27 = arith.constant 0 : index
    %52 = vector.load %arg8[%c0_26, %c0_27] : memref<1x64xf32, #tpu.memory_space<vmem>>, vector<1x64xf32>
    %53 = vector.broadcast %52 : vector<1x64xf32> to vector<2x64xf32>
    %54 = arith.mulf %51, %53 : vector<2x64xf32>
    %cst_28 = arith.constant dense<0.000000e+00> : vector<2xf32>
    %55 = vector.multi_reduction <add>, %54, %cst_28 [1] : vector<2x64xf32> to vector<2xf32>
    %56 = vector.shape_cast %55 : vector<2xf32> to vector<2x1xf32>
    %c0_29 = arith.constant 0 : index
    %c0_30 = arith.constant 0 : index
    %57 = vector.load %arg9[%c0_29, %c0_30] : memref<1x1xf32, #tpu.memory_space<vmem>>, vector<1x1xf32>
    %58 = vector.broadcast %57 : vector<1x1xf32> to vector<2x1xf32>
    %59 = arith.addf %56, %58 : vector<2x1xf32>
    %c1 = arith.constant 1 : index
    %c0_31 = arith.constant 0 : index
    %c0_32 = arith.constant 0 : index
    %60 = vector.load %arg1[%c1, %c0_31, %c0_32] : memref<2x2x384xf32, #tpu.memory_space<vmem>>, vector<1x2x384xf32>
    %61 = vector.shape_cast %60 : vector<1x2x384xf32> to vector<2x384xf32>
    %c0_33 = arith.constant 0 : index
    %c0_34 = arith.constant 0 : index
    %62 = vector.load %arg2[%c0_33, %c0_34] : memref<128x384xf32, #tpu.memory_space<vmem>>, vector<128x384xf32>
    %cst_35 = arith.constant dense<0.000000e+00> : vector<2x384xf32>
    %63 = tpu.matmul %37, %62, %cst_35 {dimension_numbers = #tpu.dot_dimension_numbers<[1], [0], [0], [1], [0, 0, 1, 1], [], []>} : vector<2x128xf32>, vector<128x384xf32>, vector<2x384xf32> -> vector<2x384xf32>
    %c0_36 = arith.constant 0 : index
    %c0_37 = arith.constant 0 : index
    %64 = vector.load %arg3[%c0_36, %c0_37] : memref<1x384xf32, #tpu.memory_space<vmem>>, vector<1x384xf32>
    %65 = vector.broadcast %64 : vector<1x384xf32> to vector<2x384xf32>
    %66 = arith.addf %63, %65 : vector<2x384xf32>
    %67 = vector.extract_strided_slice %61 {offsets = [0, 0], sizes = [2, 128], strides = [1, 1]} : vector<2x384xf32> to vector<2x128xf32>
    %68 = vector.extract_strided_slice %66 {offsets = [0, 0], sizes = [2, 128], strides = [1, 1]} : vector<2x384xf32> to vector<2x128xf32>
    %69 = arith.addf %67, %68 : vector<2x128xf32>
    %cst_38 = arith.constant 5.000000e-01 : f32
    %70 = vector.broadcast %cst_38 : f32 to vector<2x128xf32>
    %71 = arith.mulf %70, %69 : vector<2x128xf32>
    %72 = math.tanh %71 : vector<2x128xf32>
    %cst_39 = arith.constant 5.000000e-01 : f32
    %73 = vector.broadcast %cst_39 : f32 to vector<2x128xf32>
    %74 = arith.mulf %73, %72 : vector<2x128xf32>
    %cst_40 = arith.constant 5.000000e-01 : f32
    %75 = vector.broadcast %cst_40 : f32 to vector<2x128xf32>
    %76 = arith.addf %74, %75 : vector<2x128xf32>
    %77 = vector.extract_strided_slice %61 {offsets = [0, 128], sizes = [2, 128], strides = [1, 1]} : vector<2x384xf32> to vector<2x128xf32>
    %78 = vector.extract_strided_slice %66 {offsets = [0, 128], sizes = [2, 128], strides = [1, 1]} : vector<2x384xf32> to vector<2x128xf32>
    %79 = arith.addf %77, %78 : vector<2x128xf32>
    %cst_41 = arith.constant 5.000000e-01 : f32
    %80 = vector.broadcast %cst_41 : f32 to vector<2x128xf32>
    %81 = arith.mulf %80, %79 : vector<2x128xf32>
    %82 = math.tanh %81 : vector<2x128xf32>
    %cst_42 = arith.constant 5.000000e-01 : f32
    %83 = vector.broadcast %cst_42 : f32 to vector<2x128xf32>
    %84 = arith.mulf %83, %82 : vector<2x128xf32>
    %cst_43 = arith.constant 5.000000e-01 : f32
    %85 = vector.broadcast %cst_43 : f32 to vector<2x128xf32>
    %86 = arith.addf %84, %85 : vector<2x128xf32>
    %87 = vector.extract_strided_slice %61 {offsets = [0, 256], sizes = [2, 128], strides = [1, 1]} : vector<2x384xf32> to vector<2x128xf32>
    %88 = vector.extract_strided_slice %66 {offsets = [0, 256], sizes = [2, 128], strides = [1, 1]} : vector<2x384xf32> to vector<2x128xf32>
    %89 = arith.mulf %76, %88 : vector<2x128xf32>
    %90 = arith.addf %87, %89 : vector<2x128xf32>
    %91 = math.tanh %90 : vector<2x128xf32>
    %cst_44 = arith.constant 1.000000e+00 : f32
    %92 = vector.broadcast %cst_44 : f32 to vector<2x128xf32>
    %93 = arith.subf %92, %86 : vector<2x128xf32>
    %94 = arith.mulf %93, %91 : vector<2x128xf32>
    %95 = arith.mulf %86, %37 : vector<2x128xf32>
    %96 = arith.addf %94, %95 : vector<2x128xf32>
    %c0_45 = arith.constant 0 : index
    %c0_46 = arith.constant 0 : index
    %97 = vector.load %arg4[%c0_45, %c0_46] : memref<128x128xf32, #tpu.memory_space<vmem>>, vector<128x128xf32>
    %cst_47 = arith.constant dense<0.000000e+00> : vector<2x128xf32>
    %98 = tpu.matmul %96, %97, %cst_47 {dimension_numbers = #tpu.dot_dimension_numbers<[1], [0], [0], [1], [0, 0, 1, 1], [], []>} : vector<2x128xf32>, vector<128x128xf32>, vector<2x128xf32> -> vector<2x128xf32>
    %c0_48 = arith.constant 0 : index
    %c0_49 = arith.constant 0 : index
    %99 = vector.load %arg5[%c0_48, %c0_49] : memref<1x128xf32, #tpu.memory_space<vmem>>, vector<1x128xf32>
    %100 = vector.broadcast %99 : vector<1x128xf32> to vector<2x128xf32>
    %101 = arith.addf %98, %100 : vector<2x128xf32>
    %cst_50 = arith.constant 0.000000e+00 : f32
    %102 = vector.broadcast %cst_50 : f32 to vector<2x128xf32>
    %103 = arith.maximumf %101, %102 : vector<2x128xf32>
    %c0_51 = arith.constant 0 : index
    %c0_52 = arith.constant 0 : index
    %104 = vector.load %arg6[%c0_51, %c0_52] : memref<128x64xf32, #tpu.memory_space<vmem>>, vector<128x64xf32>
    %cst_53 = arith.constant dense<0.000000e+00> : vector<2x64xf32>
    %105 = tpu.matmul %103, %104, %cst_53 {dimension_numbers = #tpu.dot_dimension_numbers<[1], [0], [0], [1], [0, 0, 1, 1], [], []>} : vector<2x128xf32>, vector<128x64xf32>, vector<2x64xf32> -> vector<2x64xf32>
    %c0_54 = arith.constant 0 : index
    %c0_55 = arith.constant 0 : index
    %106 = vector.load %arg7[%c0_54, %c0_55] : memref<1x64xf32, #tpu.memory_space<vmem>>, vector<1x64xf32>
    %107 = vector.broadcast %106 : vector<1x64xf32> to vector<2x64xf32>
    %108 = arith.addf %105, %107 : vector<2x64xf32>
    %cst_56 = arith.constant 0.000000e+00 : f32
    %109 = vector.broadcast %cst_56 : f32 to vector<2x64xf32>
    %110 = arith.maximumf %108, %109 : vector<2x64xf32>
    %c0_57 = arith.constant 0 : index
    %c0_58 = arith.constant 0 : index
    %111 = vector.load %arg8[%c0_57, %c0_58] : memref<1x64xf32, #tpu.memory_space<vmem>>, vector<1x64xf32>
    %112 = vector.broadcast %111 : vector<1x64xf32> to vector<2x64xf32>
    %113 = arith.mulf %110, %112 : vector<2x64xf32>
    %cst_59 = arith.constant dense<0.000000e+00> : vector<2xf32>
    %114 = vector.multi_reduction <add>, %113, %cst_59 [1] : vector<2x64xf32> to vector<2xf32>
    %115 = vector.shape_cast %114 : vector<2xf32> to vector<2x1xf32>
    %c0_60 = arith.constant 0 : index
    %c0_61 = arith.constant 0 : index
    %116 = vector.load %arg9[%c0_60, %c0_61] : memref<1x1xf32, #tpu.memory_space<vmem>>, vector<1x1xf32>
    %117 = vector.broadcast %116 : vector<1x1xf32> to vector<2x1xf32>
    %118 = arith.addf %115, %117 : vector<2x1xf32>
    %cst_62 = arith.constant 0.000000e+00 : f32
    %119 = vector.broadcast %cst_62 : f32 to vector<2x126xf32>
    %120 = tpu.concatenate %59, %118, %119 in 1 : vector<2x1xf32>, vector<2x1xf32>, vector<2x126xf32> -> vector<2x128xf32>
    %c0_63 = arith.constant 0 : index
    %c0_64 = arith.constant 0 : index
    %121 = vector.load %arg10[%c0_63, %c0_64] : memref<2x128xf32, #tpu.memory_space<vmem>>, vector<2x128xf32>
    tpu.vector_store %arg10[%c0_63, %c0_64], %120 {strides = array<i32>} : memref<2x128xf32, #tpu.memory_space<vmem>>, vector<2x128xf32>,
    %c0_65 = arith.constant 0 : index
    %c0_66 = arith.constant 0 : index
    %122 = vector.load %arg11[%c0_65, %c0_66] : memref<2x128xf32, #tpu.memory_space<vmem>>, vector<2x128xf32>
    tpu.vector_store %arg11[%c0_65, %c0_66], %96 {strides = array<i32>} : memref<2x128xf32, #tpu.memory_space<vmem>>, vector<2x128xf32>,
    return
  }
  func.func @transform_0(%arg0: i32) -> (i32, i32, i32) {
    %c0_i32 = arith.constant 0 : i32
    %c0_i32_0 = arith.constant 0 : i32
    %c0_i32_1 = arith.constant 0 : i32
    return %c0_i32, %arg0, %c0_i32_0 : i32, i32, i32
  }
  func.func @transform_1(%arg0: i32) -> (i32, i32) {
    %c0_i32 = arith.constant 0 : i32
    %c0_i32_0 = arith.constant 0 : i32
    %c0_i32_1 = arith.constant 0 : i32
    return %c0_i32, %c0_i32_0 : i32, i32
  }
  func.func @transform_2(%arg0: i32) -> (i32, i32) {
    %c0_i32 = arith.constant 0 : i32
    %c0_i32_0 = arith.constant 0 : i32
    %c0_i32_1 = arith.constant 0 : i32
    return %c0_i32, %c0_i32_0 : i32, i32
  }
  func.func @transform_3(%arg0: i32) -> (i32, i32) {
    %c0_i32 = arith.constant 0 : i32
    %c0_i32_0 = arith.constant 0 : i32
    %c0_i32_1 = arith.constant 0 : i32
    return %c0_i32, %c0_i32_0 : i32, i32
  }
  func.func @transform_4(%arg0: i32) -> (i32, i32) {
    %c0_i32 = arith.constant 0 : i32
    %c0_i32_0 = arith.constant 0 : i32
    %c0_i32_1 = arith.constant 0 : i32
    return %c0_i32, %c0_i32_0 : i32, i32
  }
  func.func @transform_5(%arg0: i32) -> (i32, i32) {
    %c0_i32 = arith.constant 0 : i32
    %c0_i32_0 = arith.constant 0 : i32
    %c0_i32_1 = arith.constant 0 : i32
    return %c0_i32, %c0_i32_0 : i32, i32
  }
  func.func @transform_6(%arg0: i32) -> (i32, i32) {
    %c0_i32 = arith.constant 0 : i32
    %c0_i32_0 = arith.constant 0 : i32
    %c0_i32_1 = arith.constant 0 : i32
    return %c0_i32, %c0_i32_0 : i32, i32
  }
  func.func @transform_7(%arg0: i32) -> (i32, i32) {
    %c0_i32 = arith.constant 0 : i32
    %c0_i32_0 = arith.constant 0 : i32
    %c0_i32_1 = arith.constant 0 : i32
    return %c0_i32, %c0_i32_0 : i32, i32
  }
  func.func @transform_8(%arg0: i32) -> (i32, i32) {
    %c0_i32 = arith.constant 0 : i32
    %c0_i32_0 = arith.constant 0 : i32
    %c0_i32_1 = arith.constant 0 : i32
    return %c0_i32, %c0_i32_0 : i32, i32
  }
  func.func @transform_9(%arg0: i32) -> (i32, i32) {
    %c0_i32 = arith.constant 0 : i32
    %c0_i32_0 = arith.constant 0 : i32
    return %arg0, %c0_i32 : i32, i32
  }
  func.func @transform_10(%arg0: i32) -> (i32, i32) {
    %c0_i32 = arith.constant 0 : i32
    %c0_i32_0 = arith.constant 0 : i32
    return %arg0, %c0_i32 : i32, i32
  }
}

</mosaic_0001>

<bundles_post_ra>
// kernel: critic_impala_forward.4
= control target key start
LH: loop header
LB: loop body
LE: loop exit
PB: predicated region body
PF: predicated region fallthrough
CT: control target
= control target key end

     0   :  { %v1199_v17 = vmov 0   ;;  %vm334_vm0 = vcmask 523264   ;;  %s2245_s0 = inlined_call_operand.vmem [shape: f32[192,1600], index: 0, kind: input, shape index: {}]   ;;  %s2246_s1 = inlined_call_operand.vmem [shape: f32[8,192], index: 1, kind: input, shape index: {}]   ;;  %s2247_s2 = inlined_call_operand.vmem [shape: f32[8,1], index: 2, kind: input, shape index: {}]   ;;  %s2248_s3 = inlined_call_operand.vmem [shape: f32[8,1600], index: 3, kind: output, shape index: {}]  }
   0x1   :  { %v17_v0 = vld [vmem:[%s2245_s0 + $0x8] sm:$0xff]  ;;  %v30_v1 = vld [vmem:[%s2245_s0 + $0x70] sm:$0xff]  ;;  %v16_v2 = vld [vmem:[%s2245_s0] sm:$0xff]  ;;  %1197 = vset.pattern.permute.xlu0 %v1199_v17 }
   0x2   :  { %v871_v3 = vpack.c.bf16 %v30_v1, %v17_v0  ;;  %v29_v4 = vld [vmem:[%s2245_s0 + $0x68] sm:$0xff]  ;;  %v43_v5 = vld [vmem:[%s2245_s0 + $0xd8] sm:$0xff]  ;;  %v56_v6 = vld [vmem:[%s2245_s0 + $0x140] sm:$0xff] }
   0x3   :  { %v873_v7 = vpack.c.bf16 %v29_v4, %v16_v2  ;;  %v875_v8 = vpack.c.bf16 %v56_v6, %v43_v5  ;;  %v42_v9 = vld [vmem:[%s2245_s0 + $0xd0] sm:$0xff]  ;;  %v55_v10 = vld [vmem:[%s2245_s0 + $0x138] sm:$0xff]  ;;  %v69_v11 = vld [vmem:[%s2245_s0 + $0x1a8] sm:$0xff] }
   0x4   :  { %872 = vmatprep.subr.bf16.mxu0 %v871_v3  ;;  %v82_v12 = vld [vmem:[%s2245_s0 + $0x210] sm:$0xff]  ;;  %v877_v13 = vpack.c.bf16 %v55_v10, %v42_v9  ;;  %v68_v15 = vld [vmem:[%s2245_s0 + $0x1a0] sm:$0xff]  ;;  %v81_v16 = vld [vmem:[%s2245_s0 + $0x208] sm:$0xff] }
   0x5   :  { %874 = vmatpush1.bf16.msra.mxu0 %v873_v7  ;;  %v879_v14 = vpack.c.bf16 %v82_v12, %v69_v11  ;;  %v95_v18 = vld [vmem:[%s2245_s0 + $0x278] sm:$0xff]  ;;  %v108_v19 = vld [vmem:[%s2245_s0 + $0x2e0] sm:$0xff]  ;;  %v881_v20 = vpack.c.bf16 %v81_v16, %v68_v15  ;;  %v94_v22 = vld [vmem:[%s2245_s0 + $0x270] sm:$0xff] }
   0x6   :  { %876 = vmatprep.subr.bf16.mxu0 %v875_v8  ;;  %v883_v21 = vpack.c.bf16 %v108_v19, %v95_v18  ;;  %v107_v23 = vld [vmem:[%s2245_s0 + $0x2d8] sm:$0xff]  ;;  %v121_v24 = vld [vmem:[%s2245_s0 + $0x348] sm:$0xff]  ;;  %v134_v25 = vld [vmem:[%s2245_s0 + $0x3b0] sm:$0xff] }
   0x7   :  { %v885_v26 = vpack.c.bf16 %v107_v23, %v94_v22  ;;  %v887_v27 = vpack.c.bf16 %v134_v25, %v121_v24  ;;  %v120_v28 = vld [vmem:[%s2245_s0 + $0x340] sm:$0xff]  ;;  %v133_v29 = vld [vmem:[%s2245_s0 + $0x3a8] sm:$0xff]  ;;  %v147_v30 = vld [vmem:[%s2245_s0 + $0x418] sm:$0xff] }
   0x8   :  { %v160_v31 = vld [vmem:[%s2245_s0 + $0x480] sm:$0xff]  ;;  %v146_v32 = vld [vmem:[%s2245_s0 + $0x410] sm:$0xff]  ;;  %v889_v33 = vpack.c.bf16 %v133_v29, %v120_v28  ;;  %v19_v34 = vld [vmem:[%s2245_s0 + $0x18] sm:$0xff] }
   0x9   :  { %878 = vmatpush1.bf16.msra.mxu0 %v877_v13  ;;  %v32_v35 = vld [vmem:[%s2245_s0 + $0x80] sm:$0xff]  ;;  %v1299_v36 = vld [vmem:[%s2246_s1 + $0x8] sm:$0xff]  ;;  %v891_v37 = vpack.c.bf16 %v160_v31, %v147_v30  ;;  %v159_v38 = vld [vmem:[%s2245_s0 + $0x478] sm:$0xff] }
   0xa   :  { %880 = vmatprep.subr.bf16.mxu0 %v879_v14  ;;  %v919_v39 = vpack.c.bf16 %v32_v35, %v19_v34  ;;  %864 = vmatprep.mubr.msk.f32.mxu0 %vm334_vm0, %v1299_v36  ;;  %v18_v40 = vld [vmem:[%s2245_s0 + $0x10] sm:$0xff]  ;;  %v31_v41 = vld [vmem:[%s2245_s0 + $0x78] sm:$0xff]  ;;  %v173_v42 = vld [vmem:[%s2245_s0 + $0x4e8] sm:$0xff]  ;;  %v893_v47 = vpack.c.bf16 %v159_v38, %v146_v32 }
   0xb   :  { %v186_v43 = vld [vmem:[%s2245_s0 + $0x550] sm:$0xff]  ;;  %v921_v44 = vpack.c.bf16 %v31_v41, %v18_v40  ;;  %865 = vmatprep.mubr.msk.f32.mxu1 %vm334_vm0, %v1299_v36  ;;  %v45_v45 = vld [vmem:[%s2245_s0 + $0xe8] sm:$0xff]  ;;  %v172_v48 = vld [vmem:[%s2245_s0 + $0x4e0] sm:$0xff] }
   0xc   :  { %920 = vmatprep.subr.bf16.mxu1 %v919_v39  ;;  %v58_v46 = vld [vmem:[%s2245_s0 + $0x150] sm:$0xff]  ;;  %v44_v50 = vld [vmem:[%s2245_s0 + $0xe0] sm:$0xff]  ;;  %v57_v51 = vld [vmem:[%s2245_s0 + $0x148] sm:$0xff]  ;;  %v895_v52 = vpack.c.bf16 %v186_v43, %v173_v42 }
   0xd   :  { %882 = vmatpush1.bf16.msra.mxu0 %v881_v20  ;;  %922 = vmatpush1.bf16.msra.mxu1 %v921_v44  ;;  %v923_v49 = vpack.c.bf16 %v58_v46, %v45_v45  ;;  %v185_v53 = vld [vmem:[%s2245_s0 + $0x548] sm:$0xff]  ;;  %v199_v54 = vld [vmem:[%s2245_s0 + $0x5b8] sm:$0xff]  ;;  %v212_v55 = vld [vmem:[%s2245_s0 + $0x620] sm:$0xff]  ;;  %v925_v56 = vpack.c.bf16 %v57_v51, %v44_v50 }
   0xe   :  { %884 = vmatprep.subr.bf16.mxu0 %v883_v21  ;;  %v71_v57 = vld [vmem:[%s2245_s0 + $0x1b8] sm:$0xff]  ;;  %v84_v58 = vld [vmem:[%s2245_s0 + $0x220] sm:$0xff]  ;;  %v70_v59 = vld [vmem:[%s2245_s0 + $0x1b0] sm:$0xff]  ;;  %v897_v62 = vpack.c.bf16 %v185_v53, %v172_v48  ;;  %v899_v3 = vpack.c.bf16 %v212_v55, %v199_v54 }
   0xf   :  { %924 = vmatprep.subr.bf16.mxu1 %v923_v49  ;;  %v927_v60 = vpack.c.bf16 %v84_v58, %v71_v57  ;;  %v83_v61 = vld [vmem:[%s2245_s0 + $0x218] sm:$0xff]  ;;  %v198_v63 = vld [vmem:[%s2245_s0 + $0x5b0] sm:$0xff]  ;;  %v97_v2 = vld [vmem:[%s2245_s0 + $0x288] sm:$0xff] }
  0x10   :  { %v211_v0 = vld [vmem:[%s2245_s0 + $0x618] sm:$0xff]  ;;  %v929_v1 = vpack.c.bf16 %v83_v61, %v70_v59  ;;  %v110_v4 = vld [vmem:[%s2245_s0 + $0x2f0] sm:$0xff]  ;;  %v96_v5 = vld [vmem:[%s2245_s0 + $0x280] sm:$0xff] }
  0x11   :  { %886 = vmatpush1.bf16.msra.mxu0 %v885_v26  ;;  %926 = vmatpush1.bf16.msra.mxu1 %v925_v56  ;;  %v109_v6 = vld [vmem:[%s2245_s0 + $0x2e8] sm:$0xff]  ;;  %v238_v8 = vld [vmem:[%s2245_s0 + $0x6f0] sm:$0xff]  ;;  %v931_v9 = vpack.c.bf16 %v110_v4, %v97_v2  ;;  %v123_v10 = vld [vmem:[%s2245_s0 + $0x358] sm:$0xff]  ;;  %v901_v12 = vpack.c.bf16 %v211_v0, %v198_v63 }
  0x12   :  { %888 = vmatprep.subr.bf16.mxu0 %v887_v27  ;;  %928 = vmatprep.subr.bf16.mxu1 %v927_v60  ;;  %v225_v7 = vld [vmem:[%s2245_s0 + $0x688] sm:$0xff]  ;;  %v136_v11 = vld [vmem:[%s2245_s0 + $0x3c0] sm:$0xff]  ;;  %v933_v15 = vpack.c.bf16 %v109_v6, %v96_v5  ;;  %v251_v17 = vld [vmem:[%s2245_s0 + $0x758] sm:$0xff] }
  0x13   :  { %v224_v13 = vld [vmem:[%s2245_s0 + $0x680] sm:$0xff]  ;;  %v237_v14 = vld [vmem:[%s2245_s0 + $0x6e8] sm:$0xff]  ;;  %v903_v16 = vpack.c.bf16 %v238_v8, %v225_v7  ;;  %v935_v18 = vpack.c.bf16 %v136_v11, %v123_v10  ;;  %v122_v19 = vld [vmem:[%s2245_s0 + $0x350] sm:$0xff] }
  0x14   :  { %v135_v20 = vld [vmem:[%s2245_s0 + $0x3b8] sm:$0xff]  ;;  %v264_v21 = vld [vmem:[%s2245_s0 + $0x7c0] sm:$0xff]  ;;  %v149_v22 = vld [vmem:[%s2245_s0 + $0x428] sm:$0xff]  ;;  %v905_v24 = vpack.c.bf16 %v237_v14, %v224_v13 }
  0x15   :  { %890 = vmatpush1.bf16.msra.mxu0 %v889_v33  ;;  %930 = vmatpush1.bf16.msra.mxu1 %v929_v1  ;;  %v162_v23 = vld [vmem:[%s2245_s0 + $0x490] sm:$0xff]  ;;  %v263_v26 = vld [vmem:[%s2245_s0 + $0x7b8] sm:$0xff]  ;;  %v937_v27 = vpack.c.bf16 %v135_v20, %v122_v19  ;;  %v907_v28 = vpack.c.bf16 %v264_v21, %v251_v17  ;;  %v277_v29 = vld [vmem:[%s2245_s0 + $0x828] sm:$0xff] }
  0x16   :  { %892 = vmatprep.subr.bf16.mxu0 %v891_v37  ;;  %932 = vmatprep.subr.bf16.mxu1 %v931_v9  ;;  %v250_v25 = vld [vmem:[%s2245_s0 + $0x750] sm:$0xff]  ;;  %v939_v30 = vpack.c.bf16 %v162_v23, %v149_v22  ;;  %v148_v31 = vld [vmem:[%s2245_s0 + $0x420] sm:$0xff]  ;;  %v161_v32 = vld [vmem:[%s2245_s0 + $0x488] sm:$0xff] }
  0x17   :  { %v290_v33 = vld [vmem:[%s2245_s0 + $0x890] sm:$0xff]  ;;  %v175_v34 = vld [vmem:[%s2245_s0 + $0x4f8] sm:$0xff]  ;;  %v188_v35 = vld [vmem:[%s2245_s0 + $0x560] sm:$0xff]  ;;  %v909_v37 = vpack.c.bf16 %v263_v26, %v250_v25  ;;  %v941_v40 = vpack.c.bf16 %v161_v32, %v148_v31 }
  0x18   :  { %v276_v38 = vld [vmem:[%s2245_s0 + $0x820] sm:$0xff]  ;;  %v289_v39 = vld [vmem:[%s2245_s0 + $0x888] sm:$0xff]  ;;  %v911_v41 = vpack.c.bf16 %v290_v33, %v277_v29  ;;  %v303_v42 = vld [vmem:[%s2245_s0 + $0x8f8] sm:$0xff]  ;;  %v943_v43 = vpack.c.bf16 %v188_v35, %v175_v34 }
  0x19   :  { %894 = vmatpush1.bf16.msra.mxu0 %v893_v47  ;;  %934 = vmatpush1.bf16.msra.mxu1 %v933_v15  ;;  %v174_v44 = vld [vmem:[%s2245_s0 + $0x4f0] sm:$0xff]  ;;  %v187_v45 = vld [vmem:[%s2245_s0 + $0x558] sm:$0xff]  ;;  %v316_v46 = vld [vmem:[%s2245_s0 + $0x960] sm:$0xff]  ;;  %v913_v49 = vpack.c.bf16 %v289_v39, %v276_v38 }
  0x1a   :  { %896 = vmatprep.subr.bf16.mxu0 %v895_v52  ;;  %936 = vmatprep.subr.bf16.mxu1 %v935_v18  ;;  %v201_v47 = vld [vmem:[%s2245_s0 + $0x5c8] sm:$0xff]  ;;  %v214_v48 = vld [vmem:[%s2245_s0 + $0x630] sm:$0xff]  ;;  %v315_v51 = vld [vmem:[%s2245_s0 + $0x958] sm:$0xff]  ;;  %v945_v52 = vpack.c.bf16 %v187_v45, %v174_v44  ;;  %v915_v53 = vpack.c.bf16 %v316_v46, %v303_v42 }
  0x1b   :  { %v302_v50 = vld [vmem:[%s2245_s0 + $0x8f0] sm:$0xff]  ;;  %v21_v54 = vld [vmem:[%s2245_s0 + $0x28] sm:$0xff]  ;;  %v947_v55 = vpack.c.bf16 %v214_v48, %v201_v47  ;;  %v200_v56 = vld [vmem:[%s2245_s0 + $0x5c0] sm:$0xff] }
  0x1c   :  { %v213_v57 = vld [vmem:[%s2245_s0 + $0x628] sm:$0xff]  ;;  %v34_v58 = vld [vmem:[%s2245_s0 + $0x90] sm:$0xff]  ;;  %v227_v59 = vld [vmem:[%s2245_s0 + $0x698] sm:$0xff]  ;;  %v917_v61 = vpack.c.bf16 %v315_v51, %v302_v50 }
  0x1d   :  { %898 = vmatpush1.bf16.msra.mxu0 %v897_v62  ;;  %938 = vmatpush1.bf16.msra.mxu1 %v937_v27  ;;  %v240_v60 = vld [vmem:[%s2245_s0 + $0x700] sm:$0xff]  ;;  %v33_v63 = vld [vmem:[%s2245_s0 + $0x88] sm:$0xff]  ;;  %v949_v0 = vpack.c.bf16 %v213_v57, %v200_v56  ;;  %v967_v1 = vpack.c.bf16 %v34_v58, %v21_v54  ;;  %v47_v2 = vld [vmem:[%s2245_s0 + $0xf8] sm:$0xff] }
  0x1e   :  { %900 = vmatprep.subr.bf16.mxu0 %v899_v3  ;;  %940 = vmatprep.subr.bf16.mxu1 %v939_v30  ;;  %v20_v62 = vld [vmem:[%s2245_s0 + $0x20] sm:$0xff]  ;;  %v951_v3 = vpack.c.bf16 %v240_v60, %v227_v59  ;;  %v226_v4 = vld [vmem:[%s2245_s0 + $0x690] sm:$0xff]  ;;  %v239_v5 = vld [vmem:[%s2245_s0 + $0x6f8] sm:$0xff] }
  0x1f   :  { %v60_v6 = vld [vmem:[%s2245_s0 + $0x160] sm:$0xff]  ;;  %v253_v7 = vld [vmem:[%s2245_s0 + $0x768] sm:$0xff]  ;;  %v266_v8 = vld [vmem:[%s2245_s0 + $0x7d0] sm:$0xff]  ;;  %v969_v10 = vpack.c.bf16 %v33_v63, %v20_v62  ;;  %v953_v13 = vpack.c.bf16 %v239_v5, %v226_v4 }
  0x20   :  { %v1509_v9 = vld [vmem:[%s2246_s1] sm:$0xff]  ;;  %v46_v11 = vld [vmem:[%s2245_s0 + $0xf0] sm:$0xff]  ;;  %v971_v14 = vpack.c.bf16 %v60_v6, %v47_v2  ;;  %v73_v15 = vld [vmem:[%s2245_s0 + $0x1c8] sm:$0xff] }
  0x21   :  { %902 = vmatpush1.bf16.msra.mxu0 %v901_v12  ;;  %942 = vmatpush1.bf16.msra.mxu1 %v941_v40  ;;  %v59_v12 = vld [vmem:[%s2245_s0 + $0x158] sm:$0xff]  ;;  %v252_v17 = vld [vmem:[%s2245_s0 + $0x760] sm:$0xff]  ;;  %v265_v18 = vld [vmem:[%s2245_s0 + $0x7c8] sm:$0xff] }
  0x22   :  { %904 = vmatprep.subr.bf16.mxu0 %v903_v16  ;;  %944 = vmatprep.subr.bf16.mxu1 %v943_v43  ;;  %v955_v16 = vpack.c.bf16 %v266_v8, %v253_v7  ;;  %v86_v19 = vld [vmem:[%s2245_s0 + $0x230] sm:$0xff]  ;;  %v279_v20 = vld [vmem:[%s2245_s0 + $0x838] sm:$0xff]  ;;  %v292_v21 = vld [vmem:[%s2245_s0 + $0x8a0] sm:$0xff]  ;;  %v973_v22 = vpack.c.bf16 %v59_v12, %v46_v11  ;;  %v957_v25 = vpack.c.bf16 %v265_v18, %v252_v17 }
  0x23   :  { %v72_v23 = vld [vmem:[%s2245_s0 + $0x1c0] sm:$0xff]  ;;  %v975_v26 = vpack.c.bf16 %v86_v19, %v73_v15  ;;  %v99_v27 = vld [vmem:[%s2245_s0 + $0x298] sm:$0xff]  ;;  %v278_v29 = vld [vmem:[%s2245_s0 + $0x830] sm:$0xff] }
  0x24   :  { %v291_v30 = vld [vmem:[%s2245_s0 + $0x898] sm:$0xff]  ;;  %v112_v31 = vld [vmem:[%s2245_s0 + $0x300] sm:$0xff]  ;;  %v305_v32 = vld [vmem:[%s2245_s0 + $0x908] sm:$0xff] }
  0x25   :  { %906 = vmatpush1.bf16.msra.mxu0 %v905_v24  ;;  %946 = vmatpush1.bf16.msra.mxu1 %v945_v52  ;;  %v85_v24 = vld [vmem:[%s2245_s0 + $0x228] sm:$0xff]  ;;  %v318_v33 = vld [vmem:[%s2245_s0 + $0x970] sm:$0xff]  ;;  %v961_v38 = vpack.c.bf16 %v291_v30, %v278_v29  ;;  %v979_v39 = vpack.c.bf16 %v112_v31, %v99_v27  ;;  %v304_v42 = vld [vmem:[%s2245_s0 + $0x900] sm:$0xff] }
  0x26   :  { %908 = vmatprep.subr.bf16.mxu0 %v907_v28  ;;  %948 = vmatprep.subr.bf16.mxu1 %v947_v55  ;;  %v959_v28 = vpack.c.bf16 %v292_v21, %v279_v20  ;;  %v977_v34 = vpack.c.bf16 %v85_v24, %v72_v23  ;;  %v98_v35 = vld [vmem:[%s2245_s0 + $0x290] sm:$0xff]  ;;  %v125_v40 = vld [vmem:[%s2245_s0 + $0x368] sm:$0xff]  ;;  %v23_v45 = vld [vmem:[%s2245_s0 + $0x38] sm:$0xff] }
  0x27   :  { %v317_v43 = vld [vmem:[%s2245_s0 + $0x968] sm:$0xff]  ;;  %v138_v44 = vld [vmem:[%s2245_s0 + $0x3d0] sm:$0xff]  ;;  %v36_v46 = vld [vmem:[%s2245_s0 + $0xa0] sm:$0xff] }
  0x28   :  { %v124_v48 = vld [vmem:[%s2245_s0 + $0x360] sm:$0xff]  ;;  %v965_v50 = vpack.c.bf16 %v317_v43, %v304_v42  ;;  %v983_v51 = vpack.c.bf16 %v138_v44, %v125_v40  ;;  %v151_v52 = vld [vmem:[%s2245_s0 + $0x438] sm:$0xff]  ;;  %v22_v54 = vld [vmem:[%s2245_s0 + $0x30] sm:$0xff] }
  0x29   :  { %910 = vmatpush1.bf16.msra.mxu0 %v909_v37  ;;  %950 = vmatpush1.bf16.msra.mxu1 %v949_v0  ;;  %v111_v37 = vld [vmem:[%s2245_s0 + $0x2f8] sm:$0xff]  ;;  %v164_v56 = vld [vmem:[%s2245_s0 + $0x4a0] sm:$0xff]  ;;  %v49_v57 = vld [vmem:[%s2245_s0 + $0x108] sm:$0xff] }
  0x2a   :  { %912 = vmatprep.subr.bf16.mxu0 %v911_v41  ;;  %952 = vmatprep.subr.bf16.mxu1 %v951_v3  ;;  %v963_v41 = vpack.c.bf16 %v318_v33, %v305_v32  ;;  %v981_v47 = vpack.c.bf16 %v111_v37, %v98_v35  ;;  %v35_v55 = vld [vmem:[%s2245_s0 + $0x98] sm:$0xff]  ;;  %v62_v58 = vld [vmem:[%s2245_s0 + $0x170] sm:$0xff]  ;;  %v987_v63 = vpack.c.bf16 %v164_v56, %v151_v52  ;;  %v177_v0 = vld [vmem:[%s2245_s0 + $0x508] sm:$0xff] }
  0x2b   :  { %v150_v60 = vld [vmem:[%s2245_s0 + $0x430] sm:$0xff]  ;;  %v1017_v62 = vpack.c.bf16 %v35_v55, %v22_v54  ;;  %v48_v2 = vld [vmem:[%s2245_s0 + $0x100] sm:$0xff]  ;;  %v61_v3 = vld [vmem:[%s2245_s0 + $0x168] sm:$0xff] }
  0x2c   :  { %v190_v4 = vld [vmem:[%s2245_s0 + $0x570] sm:$0xff]  ;;  %v75_v5 = vld [vmem:[%s2245_s0 + $0x1d8] sm:$0xff]  ;;  %v88_v6 = vld [vmem:[%s2245_s0 + $0x240] sm:$0xff]  ;;  %v1021_v11 = vpack.c.bf16 %v61_v3, %v48_v2 }
  0x2d   :  { %914 = vmatpush1.bf16.msra.mxu0 %v913_v49  ;;  %954 = vmatpush1.bf16.msra.mxu1 %v953_v13  ;;  %v137_v49 = vld [vmem:[%s2245_s0 + $0x3c8] sm:$0xff]  ;;  %v176_v8 = vld [vmem:[%s2245_s0 + $0x500] sm:$0xff]  ;;  %v991_v12 = vpack.c.bf16 %v190_v4, %v177_v0  ;;  %v203_v13 = vld [vmem:[%s2245_s0 + $0x5d8] sm:$0xff] }
  0x2e   :  { %916 = vmatprep.subr.bf16.mxu0 %v915_v53  ;;  %956 = vmatprep.subr.bf16.mxu1 %v955_v16  ;;  %v1015_v53 = vpack.c.bf16 %v36_v46, %v23_v45  ;;  %v985_v59 = vpack.c.bf16 %v137_v49, %v124_v48  ;;  %v74_v15 = vld [vmem:[%s2245_s0 + $0x1d0] sm:$0xff]  ;;  %v87_v16 = vld [vmem:[%s2245_s0 + $0x238] sm:$0xff]  ;;  %v216_v17 = vld [vmem:[%s2245_s0 + $0x640] sm:$0xff] }
  0x2f   :  { %v101_v18 = vld [vmem:[%s2245_s0 + $0x2a8] sm:$0xff]  ;;  %v114_v19 = vld [vmem:[%s2245_s0 + $0x310] sm:$0xff]  ;;  %v1025_v24 = vpack.c.bf16 %v87_v16, %v74_v15  ;;  %v127_v30 = vld [vmem:[%s2245_s0 + $0x378] sm:$0xff] }
  0x30   :  { %v202_v21 = vld [vmem:[%s2245_s0 + $0x5d0] sm:$0xff]  ;;  %v229_v23 = vld [vmem:[%s2245_s0 + $0x6a8] sm:$0xff]  ;;  %v1027_v27 = vpack.c.bf16 %v114_v19, %v101_v18  ;;  %v140_v31 = vld [vmem:[%s2245_s0 + $0x3e0] sm:$0xff] }
  0x31   :  { %918 = vmatpush1.bf16.msra.mxu0 %v917_v61  ;;  %958 = vmatpush1.bf16.msra.mxu1 %v957_v25  ;;  %v163_v61 = vld [vmem:[%s2245_s0 + $0x498] sm:$0xff]  ;;  %v995_v25 = vpack.c.bf16 %v216_v17, %v203_v13  ;;  %v113_v29 = vld [vmem:[%s2245_s0 + $0x308] sm:$0xff]  ;;  %v328_v32 = vld [vmem:[%s2247_s2] sm:$0xff]  ;;  %v1031_v40 = vpack.c.bf16 %v140_v31, %v127_v30 }
  0x32   :  { %968 = vmatprep.subr.bf16.mxu0 %v967_v1  ;;  %960 = vmatprep.subr.bf16.mxu1 %v959_v28  ;;  %v1019_v1 = vpack.c.bf16 %v62_v58, %v49_v57  ;;  %v989_v7 = vpack.c.bf16 %v163_v61, %v150_v60  ;;  %v100_v28 = vld [vmem:[%s2245_s0 + $0x2a0] sm:$0xff]  ;;  %v241_v35 = vld [vmem:[%s2245_s0 + $0x708] sm:$0xff]  ;;  %v139_v42 = vld [vmem:[%s2245_s0 + $0x3d8] sm:$0xff] }
  0x33   :  { %331 = vperm.xlu0 %1197, %v328_v32   ;;  %v1029_v37 = vpack.c.bf16 %v113_v29, %v100_v28  ;;  %v268_v43 = vld [vmem:[%s2245_s0 + $0x7e0] sm:$0xff]  ;;  %v153_v44 = vld [vmem:[%s2245_s0 + $0x448] sm:$0xff]  ;;  %v166_v45 = vld [vmem:[%s2245_s0 + $0x4b0] sm:$0xff] }
  0x34   :  { %403 = vmatmul.mubr.f32.vlgmr.msra.gmra.mrb[0].mxu0 %v1509_v9  ;;  %v267_v48 = vld [vmem:[%s2245_s0 + $0x7d8] sm:$0xff]  ;;  %v1035_v52 = vpack.c.bf16 %v166_v45, %v153_v44  ;;  %v165_v54 = vld [vmem:[%s2245_s0 + $0x4a8] sm:$0xff]  ;;  %v294_v55 = vld [vmem:[%s2245_s0 + $0x8b0] sm:$0xff] }
  0x35   :  { %970 = vmatpush1.bf16.msra.mxu0 %v969_v10  ;;  %866 = vmatprep.mubr.msk.f32.mxu0 %vm334_vm0, %v1299_v36  ;;  %v189_v10 = vld [vmem:[%s2245_s0 + $0x568] sm:$0xff]  ;;  %v179_v56 = vld [vmem:[%s2245_s0 + $0x518] sm:$0xff]  ;;  %v192_v57 = vld [vmem:[%s2245_s0 + $0x580] sm:$0xff] }
  0x36   :  { %972 = vmatprep.subr.bf16.mxu0 %v971_v14  ;;  %962 = vmatpush1.bf16.msra.mxu1 %v961_v38  ;;  %v1023_v14 = vpack.c.bf16 %v88_v6, %v75_v5  ;;  %v993_v20 = vpack.c.bf16 %v189_v10, %v176_v8  ;;  %v293_v60 = vld [vmem:[%s2245_s0 + $0x8a8] sm:$0xff]  ;;  %v1039_v0 = vpack.c.bf16 %v192_v57, %v179_v56  ;;  %v191_v2 = vld [vmem:[%s2245_s0 + $0x578] sm:$0xff]  ;;  %v320_v3 = vld [vmem:[%s2245_s0 + $0x980] sm:$0xff] }
  0x37   :  { %964 = vmatprep.subr.bf16.mxu1 %v963_v41  ;;  %v126_v41 = vld [vmem:[%s2245_s0 + $0x370] sm:$0xff]  ;;  %v205_v4 = vld [vmem:[%s2245_s0 + $0x5e8] sm:$0xff]  ;;  %v319_v8 = vld [vmem:[%s2245_s0 + $0x978] sm:$0xff] }
  0x38   :  { %v1033_v49 = vpack.c.bf16 %v139_v42, %v126_v41  ;;  %v218_v5 = vld [vmem:[%s2245_s0 + $0x650] sm:$0xff]  ;;  %v217_v15 = vld [vmem:[%s2245_s0 + $0x648] sm:$0xff]  ;;  %v231_v17 = vld [vmem:[%s2245_s0 + $0x6b8] sm:$0xff] }
  0x39   :  { %974 = vmatpush1.bf16.msra.mxu0 %v973_v22  ;;  %v215_v22 = vld [vmem:[%s2245_s0 + $0x638] sm:$0xff]  ;;  %v1043_v13 = vpack.c.bf16 %v218_v5, %v205_v4  ;;  %v38_v16 = vld [vmem:[%s2245_s0 + $0xb0] sm:$0xff]  ;;  %v244_v18 = vld [vmem:[%s2245_s0 + $0x720] sm:$0xff] }
  0x3a   :  { %976 = vmatprep.subr.bf16.mxu0 %v975_v26  ;;  %966 = vmatpush1.bf16.msra.mxu1 %v965_v50  ;;  %v242_v26 = vld [vmem:[%s2245_s0 + $0x710] sm:$0xff]  ;;  %v997_v33 = vpack.c.bf16 %v215_v22, %v202_v21  ;;  %v37_v21 = vld [vmem:[%s2245_s0 + $0xa8] sm:$0xff]  ;;  %v64_v28 = vld [vmem:[%s2245_s0 + $0x180] sm:$0xff] }
  0x3b   :  { %1016 = vmatprep.subr.bf16.mxu1 %v1015_v53  ;;  %v999_v38 = vpack.c.bf16 %v242_v26, %v229_v23  ;;  %v152_v53 = vld [vmem:[%s2245_s0 + $0x440] sm:$0xff]  ;;  %v230_v26 = vld [vmem:[%s2245_s0 + $0x6b0] sm:$0xff]  ;;  %v257_v29 = vld [vmem:[%s2245_s0 + $0x788] sm:$0xff] }
  0x3c   :  { %v1037_v61 = vpack.c.bf16 %v165_v54, %v152_v53  ;;  %v270_v30 = vld [vmem:[%s2245_s0 + $0x7f0] sm:$0xff]  ;;  %v283_v42 = vld [vmem:[%s2245_s0 + $0x858] sm:$0xff]  ;;  %v76_v45 = vld [vmem:[%s2245_s0 + $0x1e0] sm:$0xff] }
  0x3d   :  { %978 = vmatpush1.bf16.msra.mxu0 %v977_v34  ;;  %474 = vmatmul.mubr.f32.vlgmr.msra.gmra.mrb[0].mxu1 %v1509_v9  ;;  %v228_v34 = vld [vmem:[%s2245_s0 + $0x6a0] sm:$0xff]  ;;  %v50_v32 = vld [vmem:[%s2245_s0 + $0x110] sm:$0xff]  ;;  %v309_v54 = vld [vmem:[%s2245_s0 + $0x928] sm:$0xff] }
  0x3e   :  { %980 = vmatprep.subr.bf16.mxu0 %v979_v39  ;;  %1018 = vmatpush1.bf16.msra.mxu1 %v1017_v62  ;;  %v255_v39 = vld [vmem:[%s2245_s0 + $0x778] sm:$0xff]  ;;  %v1001_v46 = vpack.c.bf16 %v241_v35, %v228_v34  ;;  %v90_v41 = vld [vmem:[%s2245_s0 + $0x250] sm:$0xff]  ;;  %v116_v53 = vld [vmem:[%s2245_s0 + $0x320] sm:$0xff] }
  0x3f   :  { %1020 = vmatprep.subr.bf16.mxu1 %v1019_v1  ;;  %867 = vmatprep.mubr.msk.f32.mxu1 %vm334_vm0, %v1299_v36  ;;  %v1003_v50 = vpack.c.bf16 %v268_v43, %v255_v39  ;;  %v178_v1 = vld [vmem:[%s2245_s0 + $0x510] sm:$0xff]  ;;  %v256_v39 = vld [vmem:[%s2245_s0 + $0x780] sm:$0xff] }
  0x40   :  { %v1041_v10 = vpack.c.bf16 %v191_v2, %v178_v1  ;;  %v296_v43 = vld [vmem:[%s2245_s0 + $0x8c0] sm:$0xff]  ;;  %v102_v57 = vld [vmem:[%s2245_s0 + $0x2b0] sm:$0xff]  ;;  %v27_v2 = vld [vmem:[%s2245_s0 + $0x58] sm:$0xff] }
  0x41   :  { %982 = vmatpush1.bf16.msra.mxu0 %v981_v47  ;;  %v254_v47 = vld [vmem:[%s2245_s0 + $0x770] sm:$0xff]  ;;  %v128_v5 = vld [vmem:[%s2245_s0 + $0x380] sm:$0xff] }
  0x42   :  { %984 = vmatprep.subr.bf16.mxu0 %v983_v51  ;;  %1022 = vmatpush1.bf16.msra.mxu1 %v1021_v11  ;;  %v281_v51 = vld [vmem:[%s2245_s0 + $0x848] sm:$0xff]  ;;  %v1005_v58 = vpack.c.bf16 %v267_v48, %v254_v47  ;;  %v142_v1 = vld [vmem:[%s2245_s0 + $0x3f0] sm:$0xff] }
  0x43   :  { %1024 = vmatprep.subr.bf16.mxu1 %v1023_v14  ;;  %v1007_v62 = vpack.c.bf16 %v294_v55, %v281_v51  ;;  %v204_v14 = vld [vmem:[%s2245_s0 + $0x5e0] sm:$0xff]  ;;  %v282_v51 = vld [vmem:[%s2245_s0 + $0x850] sm:$0xff] }
  0x44   :  { %v1045_v22 = vpack.c.bf16 %v217_v15, %v204_v14  ;;  %v322_v55 = vld [vmem:[%s2245_s0 + $0x990] sm:$0xff]  ;;  %v168_v14 = vld [vmem:[%s2245_s0 + $0x4c0] sm:$0xff]  ;;  %v53_v15 = vld [vmem:[%s2245_s0 + $0x128] sm:$0xff] }
  0x45   :  { %986 = vmatpush1.bf16.msra.mxu0 %v985_v59  ;;  %v280_v59 = vld [vmem:[%s2245_s0 + $0x840] sm:$0xff] }
  0x46   :  { %988 = vmatprep.subr.bf16.mxu0 %v987_v63  ;;  %1026 = vmatpush1.bf16.msra.mxu1 %v1025_v24  ;;  %v307_v63 = vld [vmem:[%s2245_s0 + $0x918] sm:$0xff]  ;;  %v1009_v6 = vpack.c.bf16 %v293_v60, %v280_v59 }
  0x47   :  { %1028 = vmatprep.subr.bf16.mxu1 %v1027_v27  ;;  %v1011_v11 = vpack.c.bf16 %v320_v3, %v307_v63  ;;  %v51_v24 = vld [vmem:[%s2245_s0 + $0x118] sm:$0xff]  ;;  %v308_v63 = vld [vmem:[%s2245_s0 + $0x920] sm:$0xff] }
  0x48   :  { %v243_v27 = vld [vmem:[%s2245_s0 + $0x718] sm:$0xff]  ;;  %v1067_v35 = vpack.c.bf16 %v64_v28, %v51_v24  ;;  %v40_v3 = vld [vmem:[%s2245_s0 + $0xc0] sm:$0xff] }
  0x49   :  { %990 = vmatpush1.bf16.msra.mxu0 %v989_v7  ;;  %v306_v7 = vld [vmem:[%s2245_s0 + $0x910] sm:$0xff]  ;;  %v1049_v34 = vpack.c.bf16 %v243_v27, %v230_v26  ;;  %v52_v24 = vld [vmem:[%s2245_s0 + $0x120] sm:$0xff]  ;;  %v79_v27 = vld [vmem:[%s2245_s0 + $0x1f8] sm:$0xff] }
  0x4a   :  { %992 = vmatprep.subr.bf16.mxu0 %v991_v12  ;;  %1030 = vmatpush1.bf16.msra.mxu1 %v1029_v37  ;;  %v25_v12 = vld [vmem:[%s2245_s0 + $0x48] sm:$0xff]  ;;  %v1013_v19 = vpack.c.bf16 %v319_v8, %v306_v7  ;;  %v194_v26 = vld [vmem:[%s2245_s0 + $0x590] sm:$0xff]  ;;  %v92_v28 = vld [vmem:[%s2245_s0 + $0x260] sm:$0xff] }
  0x4b   :  { %1032 = vmatprep.subr.bf16.mxu1 %v1031_v40  ;;  %v1063_v23 = vpack.c.bf16 %v38_v16, %v25_v12  ;;  %v77_v37 = vld [vmem:[%s2245_s0 + $0x1e8] sm:$0xff]  ;;  %v26_v12 = vld [vmem:[%s2245_s0 + $0x50] sm:$0xff] }
  0x4c   :  { %v269_v40 = vld [vmem:[%s2245_s0 + $0x7e8] sm:$0xff]  ;;  %v1071_v48 = vpack.c.bf16 %v90_v41, %v77_v37  ;;  %v66_v16 = vld [vmem:[%s2245_s0 + $0x190] sm:$0xff] }
  0x4d   :  { %994 = vmatpush1.bf16.msra.mxu0 %v993_v20  ;;  %v24_v20 = vld [vmem:[%s2245_s0 + $0x40] sm:$0xff]  ;;  %v1053_v47 = vpack.c.bf16 %v269_v40, %v256_v39  ;;  %v78_v37 = vld [vmem:[%s2245_s0 + $0x1f0] sm:$0xff]  ;;  %v105_v40 = vld [vmem:[%s2245_s0 + $0x2c8] sm:$0xff] }
  0x4e   :  { %996 = vmatprep.subr.bf16.mxu0 %v995_v25  ;;  %1034 = vmatpush1.bf16.msra.mxu1 %v1033_v49  ;;  %v1047_v25 = vpack.c.bf16 %v244_v18, %v231_v17  ;;  %v1065_v31 = vpack.c.bf16 %v37_v21, %v24_v20  ;;  %v103_v49 = vld [vmem:[%s2245_s0 + $0x2b8] sm:$0xff]  ;;  %v154_v18 = vld [vmem:[%s2245_s0 + $0x450] sm:$0xff]  ;;  %v220_v39 = vld [vmem:[%s2245_s0 + $0x660] sm:$0xff] }
  0x4f   :  { %1036 = vmatprep.subr.bf16.mxu1 %v1035_v52  ;;  %v295_v52 = vld [vmem:[%s2245_s0 + $0x8b8] sm:$0xff]  ;;  %v1075_v60 = vpack.c.bf16 %v116_v53, %v103_v49  ;;  %v118_v41 = vld [vmem:[%s2245_s0 + $0x330] sm:$0xff]  ;;  %v117_v49 = vld [vmem:[%s2245_s0 + $0x328] sm:$0xff] }
  0x50   :  { %v1057_v59 = vpack.c.bf16 %v295_v52, %v282_v51  ;;  %v131_v51 = vld [vmem:[%s2245_s0 + $0x398] sm:$0xff]  ;;  %v144_v52 = vld [vmem:[%s2245_s0 + $0x400] sm:$0xff] }
  0x51   :  { %998 = vmatpush1.bf16.msra.mxu0 %v997_v33  ;;  %v63_v33 = vld [vmem:[%s2245_s0 + $0x178] sm:$0xff] }
  0x52   :  { %1000 = vmatprep.subr.bf16.mxu0 %v999_v38  ;;  %1038 = vmatpush1.bf16.msra.mxu1 %v1037_v61  ;;  %v1051_v38 = vpack.c.bf16 %v270_v30, %v257_v29  ;;  %v1069_v44 = vpack.c.bf16 %v63_v33, %v50_v32  ;;  %v129_v61 = vld [vmem:[%s2245_s0 + $0x388] sm:$0xff]  ;;  %v180_v30 = vld [vmem:[%s2245_s0 + $0x520] sm:$0xff] }
  0x53   :  { %1040 = vmatprep.subr.bf16.mxu1 %v1039_v0  ;;  %v321_v0 = vld [vmem:[%s2245_s0 + $0x988] sm:$0xff]  ;;  %v1079_v8 = vpack.c.bf16 %v142_v1, %v129_v61  ;;  %v143_v61 = vld [vmem:[%s2245_s0 + $0x3f8] sm:$0xff] }
  0x54   :  { %v1061_v7 = vpack.c.bf16 %v321_v0, %v308_v63  ;;  %v157_v63 = vld [vmem:[%s2245_s0 + $0x468] sm:$0xff]  ;;  %v170_v0 = vld [vmem:[%s2245_s0 + $0x4d0] sm:$0xff] }
  0x55   :  { %1002 = vmatpush1.bf16.msra.mxu0 %v1001_v46  ;;  %v89_v46 = vld [vmem:[%s2245_s0 + $0x248] sm:$0xff] }
  0x56   :  { %1004 = vmatprep.subr.bf16.mxu0 %v1003_v50  ;;  %1042 = vmatpush1.bf16.msra.mxu1 %v1041_v10  ;;  %v1055_v50 = vpack.c.bf16 %v296_v43, %v283_v42  ;;  %v1073_v56 = vpack.c.bf16 %v89_v46, %v76_v45  ;;  %v155_v10 = vld [vmem:[%s2245_s0 + $0x458] sm:$0xff]  ;;  %v206_v43 = vld [vmem:[%s2245_s0 + $0x5f0] sm:$0xff] }
  0x57   :  { %1044 = vmatprep.subr.bf16.mxu1 %v1043_v13  ;;  %v39_v13 = vld [vmem:[%s2245_s0 + $0xb8] sm:$0xff]  ;;  %v1083_v21 = vpack.c.bf16 %v168_v14, %v155_v10  ;;  %v169_v10 = vld [vmem:[%s2245_s0 + $0x4c8] sm:$0xff] }
  0x58   :  { %v1113_v20 = vpack.c.bf16 %v39_v13, %v26_v12  ;;  %v183_v12 = vld [vmem:[%s2245_s0 + $0x538] sm:$0xff]  ;;  %v196_v13 = vld [vmem:[%s2245_s0 + $0x5a0] sm:$0xff] }
  0x59   :  { %1006 = vmatpush1.bf16.msra.mxu0 %v1005_v58  ;;  %v115_v58 = vld [vmem:[%s2245_s0 + $0x318] sm:$0xff] }
  0x5a   :  { %1008 = vmatprep.subr.bf16.mxu0 %v1007_v62  ;;  %1046 = vmatpush1.bf16.msra.mxu1 %v1045_v22  ;;  %v1059_v62 = vpack.c.bf16 %v322_v55, %v309_v54  ;;  %v1077_v4 = vpack.c.bf16 %v115_v58, %v102_v57  ;;  %v181_v22 = vld [vmem:[%s2245_s0 + $0x528] sm:$0xff]  ;;  %v232_v54 = vld [vmem:[%s2245_s0 + $0x6c0] sm:$0xff]  ;;  %v259_v58 = vld [vmem:[%s2245_s0 + $0x798] sm:$0xff] }
  0x5b   :  { %1048 = vmatprep.subr.bf16.mxu1 %v1047_v25  ;;  %v65_v25 = vld [vmem:[%s2245_s0 + $0x188] sm:$0xff]  ;;  %v1087_v33 = vpack.c.bf16 %v194_v26, %v181_v22  ;;  %v195_v22 = vld [vmem:[%s2245_s0 + $0x598] sm:$0xff] }
  0x5c   :  { %v1117_v32 = vpack.c.bf16 %v65_v25, %v52_v24  ;;  %v245_v55 = vld [vmem:[%s2245_s0 + $0x728] sm:$0xff]  ;;  %v222_v25 = vld [vmem:[%s2245_s0 + $0x670] sm:$0xff] }
  0x5d   :  { %1010 = vmatpush1.bf16.msra.mxu0 %v1009_v6  ;;  %v141_v6 = vld [vmem:[%s2245_s0 + $0x3e8] sm:$0xff]  ;;  %v1097_v1 = vpack.c.bf16 %v245_v55, %v232_v54  ;;  %v300_v54 = vld [vmem:[%s2245_s0 + $0x8e0] sm:$0xff] }
  0x5e   :  { %1012 = vmatprep.subr.bf16.mxu0 %v1011_v11  ;;  %1050 = vmatpush1.bf16.msra.mxu1 %v1049_v34  ;;  %v1111_v11 = vpack.c.bf16 %v40_v3, %v27_v2  ;;  %v1081_v17 = vpack.c.bf16 %v141_v6, %v128_v5  ;;  %v207_v34 = vld [vmem:[%s2245_s0 + $0x5f8] sm:$0xff]  ;;  %v258_v2 = vld [vmem:[%s2245_s0 + $0x790] sm:$0xff]  ;;  %v285_v6 = vld [vmem:[%s2245_s0 + $0x868] sm:$0xff] }
  0x5f   :  { %1052 = vmatprep.subr.bf16.mxu1 %v1051_v38  ;;  %v91_v38 = vld [vmem:[%s2245_s0 + $0x258] sm:$0xff]  ;;  %v1091_v46 = vpack.c.bf16 %v220_v39, %v207_v34  ;;  %v209_v24 = vld [vmem:[%s2245_s0 + $0x608] sm:$0xff] }
  0x60   :  { %v1121_v45 = vpack.c.bf16 %v91_v38, %v78_v37  ;;  %v271_v3 = vld [vmem:[%s2245_s0 + $0x7f8] sm:$0xff]  ;;  %v28_v38 = vld [vmem:[%s2245_s0 + $0x60] sm:$0xff] }
  0x61   :  { %1014 = vmatpush1.bf16.msra.mxu0 %v1013_v19  ;;  %v167_v19 = vld [vmem:[%s2245_s0 + $0x4b8] sm:$0xff]  ;;  %v1101_v14 = vpack.c.bf16 %v271_v3, %v258_v2  ;;  %v106_v2 = vld [vmem:[%s2245_s0 + $0x2d0] sm:$0xff] }
  0x62   :  { %1064 = vmatprep.subr.bf16.mxu0 %v1063_v23  ;;  %1054 = vmatpush1.bf16.msra.mxu1 %v1053_v47  ;;  %v1115_v23 = vpack.c.bf16 %v66_v16, %v53_v15  ;;  %v1085_v29 = vpack.c.bf16 %v167_v19, %v154_v18  ;;  %v233_v47 = vld [vmem:[%s2245_s0 + $0x6c8] sm:$0xff]  ;;  %v284_v15 = vld [vmem:[%s2245_s0 + $0x860] sm:$0xff]  ;;  %v311_v19 = vld [vmem:[%s2245_s0 + $0x938] sm:$0xff] }
  0x63   :  { %1056 = vmatprep.subr.bf16.mxu1 %v1055_v50  ;;  %v246_v50 = vld [vmem:[%s2245_s0 + $0x730] sm:$0xff]  ;;  %v297_v16 = vld [vmem:[%s2245_s0 + $0x8c8] sm:$0xff]  ;;  %v235_v34 = vld [vmem:[%s2245_s0 + $0x6d8] sm:$0xff] }
  0x64   :  { %545 = vmatmul.mubr.f32.vlgmr.msra.gmra.mrb[2].mxu0 %v1509_v9  ;;  %v1095_v57 = vpack.c.bf16 %v246_v50, %v233_v47  ;;  %v1105_v26 = vpack.c.bf16 %v297_v16, %v284_v15  ;;  %v54_v47 = vld [vmem:[%s2245_s0 + $0x130] sm:$0xff]  ;;  %v171_v15 = vld [vmem:[%s2245_s0 + $0x4d8] sm:$0xff] }
  0x65   :  { %1066 = vmatpush1.bf16.msra.mxu0 %v1065_v31  ;;  %868 = vmatprep.mubr.msk.f32.mxu0 %vm334_vm0, %v1299_v36  ;;  %v193_v31 = vld [vmem:[%s2245_s0 + $0x588] sm:$0xff] }
  0x66   :  { %1068 = vmatprep.subr.bf16.mxu0 %v1067_v35  ;;  %1058 = vmatpush1.bf16.msra.mxu1 %v1057_v59  ;;  %v1119_v35 = vpack.c.bf16 %v92_v28, %v79_v27  ;;  %v1089_v42 = vpack.c.bf16 %v193_v31, %v180_v30  ;;  %v1127_v59 = vpack.c.bf16 %v144_v52, %v131_v51  ;;  %v310_v27 = vld [vmem:[%s2245_s0 + $0x930] sm:$0xff]  ;;  %v323_v30 = vld [vmem:[%s2245_s0 + $0x998] sm:$0xff]  ;;  %v260_v51 = vld [vmem:[%s2245_s0 + $0x7a0] sm:$0xff] }
  0x67   :  { %1060 = vmatprep.subr.bf16.mxu1 %v1059_v62  ;;  %v272_v62 = vld [vmem:[%s2245_s0 + $0x800] sm:$0xff]  ;;  %v1139_v31 = vpack.c.bf16 %v222_v25, %v209_v24  ;;  %v1109_v37 = vpack.c.bf16 %v323_v30, %v310_v27  ;;  %v273_v52 = vld [vmem:[%s2245_s0 + $0x808] sm:$0xff]  ;;  %v275_v27 = vld [vmem:[%s2245_s0 + $0x818] sm:$0xff] }
  0x68   :  { %v1099_v5 = vpack.c.bf16 %v272_v62, %v259_v58  ;;  %v93_v58 = vld [vmem:[%s2245_s0 + $0x268] sm:$0xff] }
  0x69   :  { %1070 = vmatpush1.bf16.msra.mxu0 %v1069_v44  ;;  %v219_v44 = vld [vmem:[%s2245_s0 + $0x658] sm:$0xff]  ;;  %v313_v62 = vld [vmem:[%s2245_s0 + $0x948] sm:$0xff] }
  0x6a   :  { %1072 = vmatprep.subr.bf16.mxu0 %v1071_v48  ;;  %1062 = vmatpush1.bf16.msra.mxu1 %v1061_v7  ;;  %v104_v48 = vld [vmem:[%s2245_s0 + $0x2c0] sm:$0xff]  ;;  %v1093_v53 = vpack.c.bf16 %v219_v44, %v206_v43  ;;  %v1131_v7 = vpack.c.bf16 %v170_v0, %v157_v63  ;;  %v247_v43 = vld [vmem:[%s2245_s0 + $0x738] sm:$0xff]  ;;  %v261_v44 = vld [vmem:[%s2245_s0 + $0x7a8] sm:$0xff] }
  0x6b   :  { %1112 = vmatprep.subr.bf16.mxu1 %v1111_v11  ;;  %v298_v11 = vld [vmem:[%s2245_s0 + $0x8d0] sm:$0xff]  ;;  %v1198_v0 = vld [vmem:[%s2246_s1 + $0x8] sm:$0xff] }
  0x6c   :  { %v1103_v18 = vpack.c.bf16 %v298_v11, %v285_v6  ;;  %v326_v63 = vld [vmem:[%s2245_s0 + $0x9b0] sm:$0xff]  ;;  %v312_v6 = vld [vmem:[%s2245_s0 + $0x940] sm:$0xff]  ;;  %v249_v24 = vld [vmem:[%s2245_s0 + $0x748] sm:$0xff] }
  0x6d   :  { %1074 = vmatpush1.bf16.msra.mxu0 %v1073_v56  ;;  %616 = vmatmul.mubr.f32.vlgmr.msra.gmra.mrb[2].mxu1 %v1509_v9  ;;  %v1125_v56 = vpack.c.bf16 %v117_v49, %v104_v48  ;;  %v1200_v48 = vmov 0.0|0.0   ;;  %v67_v49 = vld [vmem:[%s2245_s0 + $0x198] sm:$0xff]  ;;  %v132_v11 = vld [vmem:[%s2245_s0 + $0x3a0] sm:$0xff]  ;;  %v301_v30 = vld [vmem:[%s2245_s0 + $0x8e8] sm:$0xff] }
  0x6e   :  { %1076 = vmatprep.subr.bf16.mxu0 %v1075_v60  ;;  %1114 = vmatpush1.bf16.msra.mxu1 %v1113_v20  ;;  %v130_v60 = vld [vmem:[%s2245_s0 + $0x390] sm:$0xff]  ;;  %v1135_v20 = vpack.c.bf16 %v196_v13, %v183_v12  ;;  %v1163_v55 = vpack.c.bf16 %v67_v49, %v54_v47  ;;  %v145_v12 = vld [vmem:[%s2245_s0 + $0x408] sm:$0xff] }
  0x6f   :  { %1116 = vmatprep.subr.bf16.mxu1 %v1115_v23  ;;  %869 = vmatprep.mubr.msk.f32.mxu1 %vm334_vm0, %v1299_v36  ;;  %v1123_v36 = vpack.c.bf16 %v118_v41, %v105_v40  ;;  %v324_v23 = vld [vmem:[%s2245_s0 + $0x9a0] sm:$0xff]  ;;  %v41_v40 = vld [vmem:[%s2245_s0 + $0xc8] sm:$0xff]  ;;  %v1172_v13 = vpack.c.bf16 %v145_v12, %v132_v11 }
  0x71   :  { %1078 = vmatpush1.bf16.msra.mxu0 %v1077_v4  ;;  %v1129_v4 = vpack.c.bf16 %v143_v61, %v130_v60  ;;  %v286_v60 = vld [vmem:[%s2245_s0 + $0x870] sm:$0xff]  ;;  %v299_v61 = vld [vmem:[%s2245_s0 + $0x8d8] sm:$0xff] }
  0x72   :  { %1080 = vmatprep.subr.bf16.mxu0 %v1079_v8  ;;  %1118 = vmatpush1.bf16.msra.mxu1 %v1117_v32  ;;  %v156_v8 = vld [vmem:[%s2245_s0 + $0x460] sm:$0xff]  ;;  %v1153_v3 = vpack.c.bf16 %v299_v61, %v286_v60 }
  0x73   :  { %1120 = vmatprep.subr.bf16.mxu1 %v1119_v35  ;;  %v208_v32 = vld [vmem:[%s2245_s0 + $0x600] sm:$0xff] }
  0x74   :  { %v248_v35 = vld [vmem:[%s2245_s0 + $0x740] sm:$0xff] }
  0x75   :  { %1082 = vmatpush1.bf16.msra.mxu0 %v1081_v17  ;;  %v1133_v17 = vpack.c.bf16 %v169_v10, %v156_v8  ;;  %v1143_v41 = vpack.c.bf16 %v248_v35, %v235_v34 }
  0x76   :  { %1084 = vmatprep.subr.bf16.mxu0 %v1083_v21  ;;  %1122 = vmatpush1.bf16.msra.mxu1 %v1121_v45  ;;  %v182_v21 = vld [vmem:[%s2245_s0 + $0x530] sm:$0xff] }
  0x77   :  { %1124 = vmatprep.subr.bf16.mxu1 %v1123_v36  ;;  %v1137_v28 = vpack.c.bf16 %v195_v22, %v182_v21  ;;  %v274_v45 = vld [vmem:[%s2245_s0 + $0x810] sm:$0xff]  ;;  %v223_v21 = vld [vmem:[%s2245_s0 + $0x678] sm:$0xff] }
  0x78   :  { %v1147_v50 = vpack.c.bf16 %v274_v45, %v261_v44 }
  0x79   :  { %1086 = vmatpush1.bf16.msra.mxu0 %v1085_v29  ;;  %v1107_v29 = vpack.c.bf16 %v324_v23, %v311_v19  ;;  %v236_v23 = vld [vmem:[%s2245_s0 + $0x6e0] sm:$0xff] }
  0x7a   :  { %1088 = vmatprep.subr.bf16.mxu0 %v1087_v33  ;;  %1126 = vmatpush1.bf16.msra.mxu1 %v1125_v56  ;;  %v221_v33 = vld [vmem:[%s2245_s0 + $0x668] sm:$0xff]  ;;  %v80_v56 = vld [vmem:[%s2245_s0 + $0x200] sm:$0xff]  ;;  %v1184_v25 = vpack.c.bf16 %v249_v24, %v236_v23 }
  0x7b   :  { %1128 = vmatprep.subr.bf16.mxu1 %v1127_v59  ;;  %v1141_v39 = vpack.c.bf16 %v221_v33, %v208_v32  ;;  %v314_v32 = vld [vmem:[%s2245_s0 + $0x950] sm:$0xff]  ;;  %v327_v33 = vld [vmem:[%s2245_s0 + $0x9b8] sm:$0xff] }
  0x7c   :  { %v1193_v34 = vpack.c.bf16 %v327_v33, %v314_v32 }
  0x7d   :  { %1090 = vmatpush1.bf16.msra.mxu0 %v1089_v42  ;;  %v234_v42 = vld [vmem:[%s2245_s0 + $0x6d0] sm:$0xff] }
  0x7e   :  { %1092 = vmatprep.subr.bf16.mxu0 %v1091_v46  ;;  %1130 = vmatpush1.bf16.msra.mxu1 %v1129_v4  ;;  %v1160_v46 = vpack.c.bf16 %v41_v40, %v28_v38  ;;  %v1145_v36 = vpack.c.bf16 %v247_v43, %v234_v42  ;;  %v119_v4 = vld [vmem:[%s2245_s0 + $0x338] sm:$0xff] }
  0x7f   :  { %1132 = vmatprep.subr.bf16.mxu1 %v1131_v7  ;;  %v325_v7 = vld [vmem:[%s2245_s0 + $0x9a8] sm:$0xff]  ;;  %v1169_v8 = vpack.c.bf16 %v119_v4, %v106_v2 }
  0x80   :  { %v1157_v10 = vpack.c.bf16 %v325_v7, %v312_v6 }
  0x81   :  { %1094 = vmatpush1.bf16.msra.mxu0 %v1093_v53  ;;  %v287_v53 = vld [vmem:[%s2245_s0 + $0x878] sm:$0xff] }
  0x82   :  { %1096 = vmatprep.subr.bf16.mxu0 %v1095_v57  ;;  %1134 = vmatpush1.bf16.msra.mxu1 %v1133_v17  ;;  %v1149_v57 = vpack.c.bf16 %v273_v52, %v260_v51  ;;  %v1151_v59 = vpack.c.bf16 %v300_v54, %v287_v53  ;;  %v184_v17 = vld [vmem:[%s2245_s0 + $0x540] sm:$0xff] }
  0x83   :  { %1136 = vmatprep.subr.bf16.mxu1 %v1135_v20  ;;  %v210_v20 = vld [vmem:[%s2245_s0 + $0x610] sm:$0xff] }
  0x84   :  { %v1181_v22 = vpack.c.bf16 %v223_v21, %v210_v20 }
  0x85   :  { %1098 = vmatpush1.bf16.msra.mxu0 %v1097_v1  ;;  %v1166_v1 = vpack.c.bf16 %v93_v58, %v80_v56 }
  0x86   :  { %1100 = vmatprep.subr.bf16.mxu0 %v1099_v5  ;;  %1138 = vmatpush1.bf16.msra.mxu1 %v1137_v28  ;;  %v1155_v5 = vpack.c.bf16 %v326_v63, %v313_v62 }
  0x87   :  { %1140 = vmatprep.subr.bf16.mxu1 %v1139_v31 }
  0x89   :  { %1102 = vmatpush1.bf16.msra.mxu0 %v1101_v14  ;;  %v158_v14 = vld [vmem:[%s2245_s0 + $0x470] sm:$0xff] }
  0x8a   :  { %1104 = vmatprep.subr.bf16.mxu0 %v1103_v18  ;;  %1142 = vmatpush1.bf16.msra.mxu1 %v1141_v39  ;;  %v1175_v16 = vpack.c.bf16 %v171_v15, %v158_v14  ;;  %v197_v18 = vld [vmem:[%s2245_s0 + $0x5a8] sm:$0xff] }
  0x8b   :  { %1144 = vmatprep.subr.bf16.mxu1 %v1143_v41  ;;  %v1178_v19 = vpack.c.bf16 %v197_v18, %v184_v17 }
  0x8d   :  { %1106 = vmatpush1.bf16.msra.mxu0 %v1105_v26  ;;  %v262_v26 = vld [vmem:[%s2245_s0 + $0x7b0] sm:$0xff] }
  0x8e   :  { %1108 = vmatprep.subr.bf16.mxu0 %v1107_v29  ;;  %1146 = vmatpush1.bf16.msra.mxu1 %v1145_v36  ;;  %v1187_v28 = vpack.c.bf16 %v275_v27, %v262_v26  ;;  %v288_v29 = vld [vmem:[%s2245_s0 + $0x880] sm:$0xff] }
  0x8f   :  { %1148 = vmatprep.subr.bf16.mxu1 %v1147_v50  ;;  %v1190_v31 = vpack.c.bf16 %v301_v30, %v288_v29 }
  0x91   :  { %1110 = vmatpush1.bf16.msra.mxu0 %v1109_v37 }
  0x92   :  { %1159 = vmatprep.subr.bf16.mxu0 %v1200_v48  ;;  %1150 = vmatpush1.bf16.msra.mxu1 %v1149_v57 }
  0x93   :  { %1152 = vmatprep.subr.bf16.mxu1 %v1151_v59 }
  0x94   :  { %687 = vmatmul.mubr.f32.vlgmr.msra.gmra.mrb[4].mxu0 %v1509_v9 }
  0x95   :  { %1161 = vmatpush1.bf16.msra.mxu0 %v1160_v46  ;;  %870 = vmatprep.mubr.msk.f32.mxu0 %vm334_vm0, %v1198_v0 }
  0x96   :  { %1162 = vmatprep.subr.bf16.mxu0 %v1200_v48  ;;  %1154 = vmatpush1.bf16.msra.mxu1 %v1153_v3 }
  0x97   :  { %1156 = vmatprep.subr.bf16.mxu1 %v1155_v5 }
  0x99   :  { %1164 = vmatpush1.bf16.msra.mxu0 %v1163_v55 }
  0x9a   :  { %1165 = vmatprep.subr.bf16.mxu0 %v1200_v48  ;;  %1158 = vmatpush1.bf16.msra.mxu1 %v1157_v10 }
  0x9d   :  { %1167 = vmatpush1.bf16.msra.mxu0 %v1166_v1  ;;  %758 = vmatmul.mubr.f32.vlgmr.msra.gmra.mrb[4].mxu1 %v1509_v9 }
  0x9e   :  { %1168 = vmatprep.subr.bf16.mxu0 %v1200_v48 }
  0xa1   :  { %1170 = vmatpush1.bf16.msra.mxu0 %v1169_v8 }
  0xa2   :  { %1171 = vmatprep.subr.bf16.mxu0 %v1200_v48 }
  0xa5   :  { %1173 = vmatpush1.bf16.msra.mxu0 %v1172_v13 }
  0xa6   :  { %1174 = vmatprep.subr.bf16.mxu0 %v1200_v48 }
  0xa9   :  { %1176 = vmatpush1.bf16.msra.mxu0 %v1175_v16 }
  0xaa   :  { %1177 = vmatprep.subr.bf16.mxu0 %v1200_v48 }
  0xad   :  { %1179 = vmatpush1.bf16.msra.mxu0 %v1178_v19 }
  0xae   :  { %1180 = vmatprep.subr.bf16.mxu0 %v1200_v48 }
  0xb1   :  { %1182 = vmatpush1.bf16.msra.mxu0 %v1181_v22 }
  0xb2   :  { %1183 = vmatprep.subr.bf16.mxu0 %v1200_v48  ;;  %v332_v35 = vpop.permute.xlu0 %331 }
  0xb5   :  { %1185 = vmatpush1.bf16.msra.mxu0 %v1184_v25 }
  0xb6   :  { %1186 = vmatprep.subr.bf16.mxu0 %v1200_v48 }
  0xb9   :  { %1188 = vmatpush1.bf16.msra.mxu0 %v1187_v28 }
  0xba   :  { %1189 = vmatprep.subr.bf16.mxu0 %v1200_v48 }
  0xbd   :  { %1191 = vmatpush1.bf16.msra.mxu0 %v1190_v31 }
  0xbe   :  { %1192 = vmatprep.subr.bf16.mxu0 %v1200_v48 }
  0xc1   :  { %1194 = vmatpush1.bf16.msra.mxu0 %v1193_v34 }
  0xc4   :  { %829 = vmatmul.mubr.f32.vlgmr.msra.gmra.mrb[6].mxu0 %v1509_v9 }
 0x107   :  { %v404_v37 = vpop.f32.mrb[0].mxu0 }
 0x108   :  { %v405_v38 = vadd.f32 %v404_v37, %v332_v35  ;;  %v406_v39 = vpop.f32.mrb[1].mxu0 }
 0x109   :  { %v407_v40 = vadd.f32 %v406_v39, %v332_v35 }
 0x10a   :  { %v834_v41 = vmax.f32 %v405_v38, 0.0 }
 0x10b   :  { %v835_v42 = vmax.f32 %v407_v40, 0.0 }
 0x10c   :  { %847 = vst [vmem:[%s2248_s3] sm:$0xff] %v834_v41 }
 0x10d   :  { %848 = vst [vmem:[%s2248_s3 + $0x8] sm:$0xff] %v835_v42 }
 0x110   :  { %v475_v43 = vpop.f32.mrb[0].mxu1 }
 0x111   :  { %v476_v44 = vadd.f32 %v475_v43, %v332_v35  ;;  %v477_v45 = vpop.f32.mrb[1].mxu1 }
 0x112   :  { %v478_v46 = vadd.f32 %v477_v45, %v332_v35 }
 0x113   :  { %v836_v9 = vmax.f32 %v476_v44, 0.0 }
 0x114   :  { %v837_v47 = vmax.f32 %v478_v46, 0.0 }
 0x115   :  { %849 = vst [vmem:[%s2248_s3 + $0x10] sm:$0xff] %v836_v9 }
 0x116   :  { %850 = vst [vmem:[%s2248_s3 + $0x18] sm:$0xff] %v837_v47 }
 0x137   :  { %v546_v36 = vpop.f32.mrb[2].mxu0 }
 0x138   :  { %v547_v48 = vadd.f32 %v546_v36, %v332_v35  ;;  %v548_v49 = vpop.f32.mrb[3].mxu0 }
 0x139   :  { %v549_v50 = vadd.f32 %v548_v49, %v332_v35 }
 0x13a   :  { %v838_v51 = vmax.f32 %v547_v48, 0.0 }
 0x13b   :  { %v839_v52 = vmax.f32 %v549_v50, 0.0 }
 0x13c   :  { %851 = vst [vmem:[%s2248_s3 + $0x20] sm:$0xff] %v838_v51 }
 0x13d   :  { %852 = vst [vmem:[%s2248_s3 + $0x28] sm:$0xff] %v839_v52 }
 0x140   :  { %v617_v53 = vpop.f32.mrb[2].mxu1 }
 0x141   :  { %v618_v54 = vadd.f32 %v617_v53, %v332_v35  ;;  %v619_v55 = vpop.f32.mrb[3].mxu1 }
 0x142   :  { %v620_v56 = vadd.f32 %v619_v55, %v332_v35 }
 0x143   :  { %v840_v57 = vmax.f32 %v618_v54, 0.0 }
 0x144   :  { %v841_v58 = vmax.f32 %v620_v56, 0.0 }
 0x145   :  { %853 = vst [vmem:[%s2248_s3 + $0x30] sm:$0xff] %v840_v57 }
 0x146   :  { %854 = vst [vmem:[%s2248_s3 + $0x38] sm:$0xff] %v841_v58 }
 0x167   :  { %v688_v59 = vpop.f32.mrb[4].mxu0 }
 0x168   :  { %v689_v60 = vadd.f32 %v688_v59, %v332_v35  ;;  %v690_v61 = vpop.f32.mrb[5].mxu0 }
 0x169   :  { %v691_v62 = vadd.f32 %v690_v61, %v332_v35 }
 0x16a   :  { %v842_v63 = vmax.f32 %v689_v60, 0.0 }
 0x16b   :  { %v843_v0 = vmax.f32 %v691_v62, 0.0 }
 0x16c   :  { %855 = vst [vmem:[%s2248_s3 + $0x40] sm:$0xff] %v842_v63 }
 0x16d   :  { %856 = vst [vmem:[%s2248_s3 + $0x48] sm:$0xff] %v843_v0 }
 0x170   :  { %v759_v1 = vpop.f32.mrb[4].mxu1 }
 0x171   :  { %v760_v2 = vadd.f32 %v759_v1, %v332_v35  ;;  %v761_v3 = vpop.f32.mrb[5].mxu1 }
 0x172   :  { %v762_v4 = vadd.f32 %v761_v3, %v332_v35 }
 0x173   :  { %v844_v5 = vmax.f32 %v760_v2, 0.0 }
 0x174   :  { %v845_v6 = vmax.f32 %v762_v4, 0.0 }
 0x175   :  { %857 = vst [vmem:[%s2248_s3 + $0x50] sm:$0xff] %v844_v5 }
 0x176   :  { %858 = vst [vmem:[%s2248_s3 + $0x58] sm:$0xff] %v845_v6 }
 0x197   :  { %v830_v7 = vpop.f32.mrb[6].mxu0 }
 0x198   :  { %v831_v8 = vadd.f32 %v830_v7, %v332_v35  ;;  %v832_v10 = vpop.f32.mrb[7].mxu0 }
 0x19a   :  { %v846_v11 = vmax.f32 %v831_v8, 0.0 }
 0x19c   :  { %859 = vst.msk [vmem:[%s2248_s3 + $0x60] sm:$0xff] %vm334_vm0, %v846_v11 }

// kernel: critic_impala_forward.5
= control target key start
LH: loop header
LB: loop body
LE: loop exit
PB: predicated region body
PF: predicated region fallthrough
CT: control target
= control target key end

     0   :  { %v334_v3 = vmov 0.0   ;;  %v335_v8 = vmov 0   ;;  %vm257_vm0 = vcmask 130048   ;;  %s590_s0 = inlined_call_operand.vmem [shape: f32[128,400], index: 0, kind: input, shape index: {}]   ;;  %s591_s2 = inlined_call_operand.vmem [shape: f32[16,1], index: 2, kind: input, shape index: {}]   ;;  %s592_s1 = inlined_call_operand.vmem [shape: f32[16,128], index: 1, kind: input, shape index: {}]   ;;  %s593_s3 = inlined_call_operand.vmem [shape: f32[16,400], index: 3, kind: output, shape index: {}]  }
   0x1   :  { %v17_v0 = vld [vmem:[%s590_s0 + $0x8] sm:$0xff]  ;;  %v19_v2 = vld [vmem:[%s590_s0 + $0x18] sm:$0xff]  ;;  %156 = vmatprep.mubr.f32.mxu0 %v334_v3  ;;  %233 = vmatprep.mubr.f32.mxu1 %v334_v3  ;;  %v16_v6 = vld [vmem:[%s590_s0] sm:$0xff] }
   0x2   :  { %v21_v1 = vld [vmem:[%s590_s0 + $0x28] sm:$0xff]  ;;  %v23_v5 = vld [vmem:[%s590_s0 + $0x38] sm:$0xff]  ;;  %v20_v7 = vld [vmem:[%s590_s0 + $0x20] sm:$0xff]  ;;  %333 = vset.pattern.permute.xlu0 %v335_v8 }
   0x3   :  { %v267_v4 = vpack.c.bf16 %v21_v1, %v17_v0  ;;  %v299_v9 = vpack.c.bf16 %v23_v5, %v19_v2  ;;  %v269_v10 = vpack.c.bf16 %v20_v7, %v16_v6  ;;  %v18_v11 = vld [vmem:[%s590_s0 + $0x10] sm:$0xff]  ;;  %v25_v13 = vld [vmem:[%s590_s0 + $0x48] sm:$0xff]  ;;  %v27_v16 = vld [vmem:[%s590_s0 + $0x58] sm:$0xff] }
   0x4   :  { %v22_v12 = vld [vmem:[%s590_s0 + $0x30] sm:$0xff]  ;;  %v29_v15 = vld [vmem:[%s590_s0 + $0x68] sm:$0xff]  ;;  %v31_v17 = vld [vmem:[%s590_s0 + $0x78] sm:$0xff] }
   0x5   :  { %268 = vmatprep.subr.bf16.mxu0 %v267_v4  ;;  %v301_v14 = vpack.c.bf16 %v22_v12, %v18_v11  ;;  %300 = vmatprep.subr.bf16.mxu1 %v299_v9  ;;  %v271_v18 = vpack.c.bf16 %v29_v15, %v25_v13  ;;  %v303_v19 = vpack.c.bf16 %v31_v17, %v27_v16  ;;  %v24_v20 = vld [vmem:[%s590_s0 + $0x40] sm:$0xff]  ;;  %v26_v22 = vld [vmem:[%s590_s0 + $0x50] sm:$0xff]  ;;  %v33_v25 = vld [vmem:[%s590_s0 + $0x88] sm:$0xff] }
   0x6   :  { %270 = vmatpush1.bf16.msra.mxu0 %v269_v10  ;;  %v28_v21 = vld [vmem:[%s590_s0 + $0x60] sm:$0xff]  ;;  %v30_v24 = vld [vmem:[%s590_s0 + $0x70] sm:$0xff]  ;;  %v37_v26 = vld [vmem:[%s590_s0 + $0xa8] sm:$0xff] }
   0x7   :  { %302 = vmatpush1.bf16.msra.mxu1 %v301_v14  ;;  %v273_v23 = vpack.c.bf16 %v28_v21, %v24_v20  ;;  %272 = vmatprep.subr.bf16.mxu0 %v271_v18  ;;  %v305_v27 = vpack.c.bf16 %v30_v24, %v26_v22  ;;  %v275_v28 = vpack.c.bf16 %v37_v26, %v33_v25  ;;  %v35_v29 = vld [vmem:[%s590_s0 + $0x98] sm:$0xff]  ;;  %v32_v31 = vld [vmem:[%s590_s0 + $0x80] sm:$0xff]  ;;  %v34_v34 = vld [vmem:[%s590_s0 + $0x90] sm:$0xff] }
   0x8   :  { %304 = vmatprep.subr.bf16.mxu1 %v303_v19  ;;  %v39_v30 = vld [vmem:[%s590_s0 + $0xb8] sm:$0xff]  ;;  %v36_v33 = vld [vmem:[%s590_s0 + $0xa0] sm:$0xff]  ;;  %v38_v35 = vld [vmem:[%s590_s0 + $0xb0] sm:$0xff] }
   0x9   :  { %v307_v32 = vpack.c.bf16 %v39_v30, %v35_v29  ;;  %v277_v36 = vpack.c.bf16 %v36_v33, %v32_v31  ;;  %v41_v37 = vld [vmem:[%s590_s0 + $0xc8] sm:$0xff]  ;;  %v43_v39 = vld [vmem:[%s590_s0 + $0xd8] sm:$0xff]  ;;  %v309_v40 = vpack.c.bf16 %v38_v35, %v34_v34  ;;  %v40_v43 = vld [vmem:[%s590_s0 + $0xc0] sm:$0xff] }
   0xa   :  { %274 = vmatpush1.bf16.msra.mxu0 %v273_v23  ;;  %v45_v38 = vld [vmem:[%s590_s0 + $0xe8] sm:$0xff]  ;;  %v47_v42 = vld [vmem:[%s590_s0 + $0xf8] sm:$0xff]  ;;  %v44_v44 = vld [vmem:[%s590_s0 + $0xe0] sm:$0xff] }
   0xb   :  { %306 = vmatpush1.bf16.msra.mxu1 %v305_v27  ;;  %276 = vmatprep.subr.bf16.mxu0 %v275_v28  ;;  %v279_v41 = vpack.c.bf16 %v45_v38, %v41_v37  ;;  %v311_v45 = vpack.c.bf16 %v47_v42, %v43_v39  ;;  %v42_v46 = vld [vmem:[%s590_s0 + $0xd0] sm:$0xff]  ;;  %v49_v48 = vld [vmem:[%s590_s0 + $0x108] sm:$0xff]  ;;  %v51_v50 = vld [vmem:[%s590_s0 + $0x118] sm:$0xff]  ;;  %v281_v52 = vpack.c.bf16 %v44_v44, %v40_v43 }
   0xc   :  { %308 = vmatprep.subr.bf16.mxu1 %v307_v32  ;;  %v46_v47 = vld [vmem:[%s590_s0 + $0xf0] sm:$0xff]  ;;  %v53_v49 = vld [vmem:[%s590_s0 + $0x128] sm:$0xff]  ;;  %v55_v51 = vld [vmem:[%s590_s0 + $0x138] sm:$0xff] }
   0xd   :  { %v313_v53 = vpack.c.bf16 %v46_v47, %v42_v46  ;;  %v283_v54 = vpack.c.bf16 %v53_v49, %v49_v48  ;;  %v48_v55 = vld [vmem:[%s590_s0 + $0x100] sm:$0xff]  ;;  %v50_v57 = vld [vmem:[%s590_s0 + $0x110] sm:$0xff]  ;;  %v315_v58 = vpack.c.bf16 %v55_v51, %v51_v50  ;;  %v57_v60 = vld [vmem:[%s590_s0 + $0x148] sm:$0xff] }
   0xe   :  { %278 = vmatpush1.bf16.msra.mxu0 %v277_v36  ;;  %v52_v56 = vld [vmem:[%s590_s0 + $0x120] sm:$0xff]  ;;  %v54_v59 = vld [vmem:[%s590_s0 + $0x130] sm:$0xff]  ;;  %v61_v61 = vld [vmem:[%s590_s0 + $0x168] sm:$0xff] }
   0xf   :  { %310 = vmatpush1.bf16.msra.mxu1 %v309_v40  ;;  %280 = vmatprep.subr.bf16.mxu0 %v279_v41  ;;  %v59_v62 = vld [vmem:[%s590_s0 + $0x158] sm:$0xff]  ;;  %v285_v0 = vpack.c.bf16 %v52_v56, %v48_v55  ;;  %v317_v1 = vpack.c.bf16 %v54_v59, %v50_v57  ;;  %v287_v2 = vpack.c.bf16 %v61_v61, %v57_v60  ;;  %v56_v4 = vld [vmem:[%s590_s0 + $0x140] sm:$0xff]  ;;  %v58_v6 = vld [vmem:[%s590_s0 + $0x150] sm:$0xff] }
  0x10   :  { %312 = vmatprep.subr.bf16.mxu1 %v311_v45  ;;  %v63_v63 = vld [vmem:[%s590_s0 + $0x178] sm:$0xff]  ;;  %v60_v5 = vld [vmem:[%s590_s0 + $0x160] sm:$0xff]  ;;  %v62_v8 = vld [vmem:[%s590_s0 + $0x170] sm:$0xff] }
  0x11   :  { %v319_v7 = vpack.c.bf16 %v63_v63, %v59_v62  ;;  %v65_v9 = vld [vmem:[%s590_s0 + $0x188] sm:$0xff]  ;;  %v67_v11 = vld [vmem:[%s590_s0 + $0x198] sm:$0xff]  ;;  %v289_v13 = vpack.c.bf16 %v60_v5, %v56_v4  ;;  %v64_v14 = vld [vmem:[%s590_s0 + $0x180] sm:$0xff]  ;;  %v321_v15 = vpack.c.bf16 %v62_v8, %v58_v6 }
  0x12   :  { %282 = vmatpush1.bf16.msra.mxu0 %v281_v52  ;;  %v69_v10 = vld [vmem:[%s590_s0 + $0x1a8] sm:$0xff]  ;;  %v71_v12 = vld [vmem:[%s590_s0 + $0x1b8] sm:$0xff]  ;;  %v68_v17 = vld [vmem:[%s590_s0 + $0x1a0] sm:$0xff] }
  0x13   :  { %314 = vmatpush1.bf16.msra.mxu1 %v313_v53  ;;  %284 = vmatprep.subr.bf16.mxu0 %v283_v54  ;;  %v291_v16 = vpack.c.bf16 %v69_v10, %v65_v9  ;;  %v66_v18 = vld [vmem:[%s590_s0 + $0x190] sm:$0xff]  ;;  %v323_v20 = vpack.c.bf16 %v71_v12, %v67_v11  ;;  %v73_v21 = vld [vmem:[%s590_s0 + $0x1c8] sm:$0xff]  ;;  %v80_v23 = vld [vmem:[%s591_s2] sm:$0xff]  ;;  %v293_v26 = vpack.c.bf16 %v68_v17, %v64_v14 }
  0x14   :  { %316 = vmatprep.subr.bf16.mxu1 %v315_v58  ;;  %v70_v19 = vld [vmem:[%s590_s0 + $0x1b0] sm:$0xff]  ;;  %v77_v22 = vld [vmem:[%s590_s0 + $0x1e8] sm:$0xff]  ;;  %v75_v24 = vld [vmem:[%s590_s0 + $0x1d8] sm:$0xff]  ;;  %84 = vperm.xlu0 %333, %v80_v23  }
  0x15   :  { %v79_v25 = vld [vmem:[%s590_s0 + $0x1f8] sm:$0xff]  ;;  %v81_v27 = vld [vmem:[%s591_s2 + $0x8] sm:$0xff]  ;;  %v325_v28 = vpack.c.bf16 %v70_v19, %v66_v18  ;;  %v295_v29 = vpack.c.bf16 %v77_v22, %v73_v21  ;;  %v72_v30 = vld [vmem:[%s590_s0 + $0x1c0] sm:$0xff] }
  0x16   :  { %286 = vmatpush1.bf16.msra.mxu0 %v285_v0  ;;  %v76_v31 = vld [vmem:[%s590_s0 + $0x1e0] sm:$0xff]  ;;  %v327_v32 = vpack.c.bf16 %v79_v25, %v75_v24  ;;  %v74_v33 = vld [vmem:[%s590_s0 + $0x1d0] sm:$0xff]  ;;  %v15_v38 = vld [vmem:[%s592_s1 + $0x8] sm:$0xff] }
  0x17   :  { %318 = vmatpush1.bf16.msra.mxu1 %v317_v1  ;;  %288 = vmatprep.subr.bf16.mxu0 %v287_v2  ;;  %v78_v34 = vld [vmem:[%s590_s0 + $0x1f0] sm:$0xff]  ;;  %v297_v35 = vpack.c.bf16 %v76_v31, %v72_v30  ;;  %v14_v37 = vld [vmem:[%s592_s1] sm:$0xff] }
  0x18   :  { %320 = vmatprep.subr.bf16.mxu1 %v319_v7  ;;  %89 = vperm.xlu0 %333, %v81_v27   ;;  %v329_v36 = vpack.c.bf16 %v78_v34, %v74_v33 }
  0x1a   :  { %290 = vmatpush1.bf16.msra.mxu0 %v289_v13 }
  0x1b   :  { %322 = vmatpush1.bf16.msra.mxu1 %v321_v15  ;;  %292 = vmatprep.subr.bf16.mxu0 %v291_v16 }
  0x1c   :  { %324 = vmatprep.subr.bf16.mxu1 %v323_v20 }
  0x1e   :  { %294 = vmatpush1.bf16.msra.mxu0 %v293_v26 }
  0x1f   :  { %326 = vmatpush1.bf16.msra.mxu1 %v325_v28  ;;  %296 = vmatprep.subr.bf16.mxu0 %v295_v29 }
  0x20   :  { %328 = vmatprep.subr.bf16.mxu1 %v327_v32 }
  0x22   :  { %298 = vmatpush1.bf16.msra.mxu0 %v297_v35 }
  0x23   :  { %330 = vmatpush1.bf16.msra.mxu1 %v329_v36 }
  0x25   :  { %157 = vmatmul.mubr.f32.vlgmr.msra.gmra.mrb[0].mxu0 %v14_v37 }
  0x26   :  { %234 = vmatmul.mubr.f32.vlgmr.msra.gmra.mrb[0].mxu1 %v14_v37  ;;  %162 = vmatprep.mubr.f32.mxu0 %v334_v3 }
  0x27   :  { %239 = vmatprep.mubr.f32.mxu1 %v334_v3 }
  0x29   :  { %163 = vmatmul.mubr.f32.gmra.mrb[2].mxu0 %v15_v38 }
  0x2a   :  { %240 = vmatmul.mubr.f32.gmra.mrb[2].mxu1 %v15_v38 }
  0x93   :  { %v85_v39 = vpop.permute.xlu0 %84 }
  0x97   :  { %v90_v50 = vpop.permute.xlu0 %89 }
  0xf8   :  { %v158_v40 = vpop.f32.mrb[0].mxu0 }
  0xf9   :  { %v159_v41 = vadd.f32 %v158_v40, %v85_v39  ;;  %v235_v42 = vpop.f32.mrb[0].mxu1  ;;  %v160_v43 = vpop.f32.mrb[1].mxu0 }
  0xfa   :  { %v236_v44 = vadd.f32 %v235_v42, %v85_v39  ;;  %v161_v45 = vadd.f32 %v160_v43, %v85_v39  ;;  %v237_v46 = vpop.f32.mrb[1].mxu1 }
  0xfb   :  { %v246_v47 = vmax.f32 %v159_v41, 0.0  ;;  %v238_v48 = vadd.f32 %v237_v46, %v85_v39 }
  0xfc   :  { %v248_v49 = vmax.f32 %v236_v44, 0.0  ;;  %v247_v51 = vmax.f32 %v161_v45, 0.0  ;;  %v164_v52 = vpop.f32.mrb[2].mxu0 }
  0xfd   :  { %254 = vst [vmem:[%s593_s3] sm:$0xff] %v246_v47  ;;  %v249_v3 = vmax.f32 %v238_v48, 0.0  ;;  %v165_v53 = vadd.f32 %v164_v52, %v90_v50  ;;  %v241_v54 = vpop.f32.mrb[2].mxu1  ;;  %v166_v55 = vpop.f32.mrb[3].mxu0 }
  0xfe   :  { %256 = vst [vmem:[%s593_s3 + $0x10] sm:$0xff] %v248_v49  ;;  %255 = vst [vmem:[%s593_s3 + $0x8] sm:$0xff] %v247_v51  ;;  %v242_v56 = vadd.f32 %v241_v54, %v90_v50  ;;  %v167_v57 = vadd.f32 %v166_v55, %v90_v50  ;;  %v243_v58 = vpop.f32.mrb[3].mxu1 }
  0xff   :  { %258 = vst.msk [vmem:[%s593_s3 + $0x18] sm:$0xff] %vm257_vm0, %v249_v3  ;;  %v250_v59 = vmax.f32 %v165_v53, 0.0  ;;  %v244_v60 = vadd.f32 %v243_v58, %v90_v50 }
 0x100   :  { %v252_v61 = vmax.f32 %v242_v56, 0.0  ;;  %v251_v62 = vmax.f32 %v167_v57, 0.0 }
 0x101   :  { %259 = vst [vmem:[%s593_s3 + $0x20] sm:$0xff] %v250_v59  ;;  %v253_v63 = vmax.f32 %v244_v60, 0.0 }
 0x102   :  { %261 = vst [vmem:[%s593_s3 + $0x30] sm:$0xff] %v252_v61  ;;  %260 = vst [vmem:[%s593_s3 + $0x28] sm:$0xff] %v251_v62 }
 0x103   :  { %262 = vst.msk [vmem:[%s593_s3 + $0x38] sm:$0xff] %vm257_vm0, %v253_v63 }

// kernel: critic_impala_forward.6
= control target key start
LH: loop header
LB: loop body
LE: loop exit
PB: predicated region body
PF: predicated region fallthrough
CT: control target
= control target key end

     0   :  { %v538_v2 = vmov 0.0|0.0   ;;  %vm81_vm0 = vcmask 130048   ;;  %vm540_vm1 = vmmov 0   ;;  %vm255_vm2 = vcmask 261120   ;;  %s796_s1 = inlined_call_operand.vmem [shape: f32[400,32], index: 1, kind: input, shape index: {}]   ;;  %s797_s0 = inlined_call_operand.vmem [shape: f32[8,400], index: 0, kind: input, shape index: {}]   ;;  %s798_s3 = inlined_call_operand.vmem [shape: f32[32,384], index: 3, kind: input, shape index: {}]   ;;  %s799_s2 = inlined_call_operand.vmem [shape: f32[1,32], index: 2, kind: input, shape index: {}]   ;;  %s800_s4 = inlined_call_operand.vmem [shape: f32[1,384], index: 4, kind: input, shape index: {}]   ;;  %s801_s5 = inlined_call_operand.vmem [shape: f32[8,384], index: 5, kind: output, shape index: {}]  }
   0x1   :  { %v40_v0 = vld [vmem:[%s796_s1 + $0x80] sm:$0xff]  ;;  %v41_v1 = vld [vmem:[%s796_s1 + $0x88] sm:$0xff]  ;;  %494 = vmatprep.subr.bf16.mxu1 %v538_v2  ;;  %v42_v10 = vld [vmem:[%s796_s1 + $0x90] sm:$0xff] }
   0x2   :  { %v24_v3 = vld [vmem:[%s796_s1] sm:$0xff]  ;;  %v462_v4 = vpack.c.bf16 %v41_v1, %v40_v0  ;;  %v25_v5 = vld [vmem:[%s796_s1 + $0x8] sm:$0xff]  ;;  %v43_v11 = vld [vmem:[%s796_s1 + $0x98] sm:$0xff] }
   0x3   :  { %v56_v6 = vld [vmem:[%s796_s1 + $0x100] sm:$0xff]  ;;  %v57_v7 = vld [vmem:[%s796_s1 + $0x108] sm:$0xff]  ;;  %v464_v8 = vpack.c.bf16 %v25_v5, %v24_v3  ;;  %v26_v12 = vld [vmem:[%s796_s1 + $0x10] sm:$0xff]  ;;  %v466_v13 = vpack.c.bf16 %v43_v11, %v42_v10 }
   0x4   :  { %v495_v9 = vpack.c.bf16 %v57_v7, %v56_v6  ;;  %463 = vmatprep.subr.bf16.mxu0 %v462_v4  ;;  %v27_v14 = vld [vmem:[%s796_s1 + $0x18] sm:$0xff]  ;;  %v58_v15 = vld [vmem:[%s796_s1 + $0x110] sm:$0xff]  ;;  %v44_v19 = vld [vmem:[%s796_s1 + $0xa0] sm:$0xff] }
   0x5   :  { %v59_v16 = vld [vmem:[%s796_s1 + $0x118] sm:$0xff]  ;;  %465 = vmatpush3.bf16.msra.mxu0 %v464_v8  ;;  %v468_v17 = vpack.c.bf16 %v27_v14, %v26_v12  ;;  %v45_v20 = vld [vmem:[%s796_s1 + $0xa8] sm:$0xff]  ;;  %v28_v21 = vld [vmem:[%s796_s1 + $0x20] sm:$0xff] }
   0x6   :  { %496 = vmatpush1.bf16.msra.mxu1 %v495_v9  ;;  %v498_v18 = vpack.c.bf16 %v59_v16, %v58_v15  ;;  %467 = vmatprep.subr.bf16.mxu0 %v466_v13  ;;  %v470_v22 = vpack.c.bf16 %v45_v20, %v44_v19  ;;  %v29_v23 = vld [vmem:[%s796_s1 + $0x28] sm:$0xff]  ;;  %v60_v24 = vld [vmem:[%s796_s1 + $0x120] sm:$0xff]  ;;  %v46_v26 = vld [vmem:[%s796_s1 + $0xb0] sm:$0xff] }
   0x7   :  { %497 = vmatprep.subr.bf16.mxu1 %v538_v2  ;;  %v61_v25 = vld [vmem:[%s796_s1 + $0x128] sm:$0xff]  ;;  %v47_v27 = vld [vmem:[%s796_s1 + $0xb8] sm:$0xff]  ;;  %v472_v28 = vpack.c.bf16 %v29_v23, %v28_v21  ;;  %v30_v30 = vld [vmem:[%s796_s1 + $0x30] sm:$0xff] }
   0x8   :  { %v501_v29 = vpack.c.bf16 %v61_v25, %v60_v24  ;;  %v474_v31 = vpack.c.bf16 %v47_v27, %v46_v26  ;;  %v31_v32 = vld [vmem:[%s796_s1 + $0x38] sm:$0xff]  ;;  %v62_v33 = vld [vmem:[%s796_s1 + $0x130] sm:$0xff]  ;;  %v48_v35 = vld [vmem:[%s796_s1 + $0xc0] sm:$0xff] }
   0x9   :  { %469 = vmatpush3.bf16.msra.mxu0 %v468_v17  ;;  %v63_v34 = vld [vmem:[%s796_s1 + $0x138] sm:$0xff]  ;;  %v49_v36 = vld [vmem:[%s796_s1 + $0xc8] sm:$0xff]  ;;  %v476_v37 = vpack.c.bf16 %v31_v32, %v30_v30  ;;  %v32_v39 = vld [vmem:[%s796_s1 + $0x40] sm:$0xff] }
   0xa   :  { %499 = vmatpush1.bf16.msra.mxu1 %v498_v18  ;;  %471 = vmatprep.subr.bf16.mxu0 %v470_v22  ;;  %v504_v38 = vpack.c.bf16 %v63_v34, %v62_v33  ;;  %v478_v40 = vpack.c.bf16 %v49_v36, %v48_v35  ;;  %v33_v41 = vld [vmem:[%s796_s1 + $0x48] sm:$0xff]  ;;  %v64_v42 = vld [vmem:[%s796_s1 + $0x140] sm:$0xff]  ;;  %v50_v44 = vld [vmem:[%s796_s1 + $0xd0] sm:$0xff]  ;;  %v539_v35 = vmov 0.0  }
   0xb   :  { %500 = vmatprep.subr.bf16.mxu1 %v538_v2  ;;  %v65_v43 = vld [vmem:[%s796_s1 + $0x148] sm:$0xff]  ;;  %v51_v45 = vld [vmem:[%s796_s1 + $0xd8] sm:$0xff]  ;;  %v480_v46 = vpack.c.bf16 %v33_v41, %v32_v39  ;;  %v34_v48 = vld [vmem:[%s796_s1 + $0x50] sm:$0xff] }
   0xc   :  { %v507_v47 = vpack.c.bf16 %v65_v43, %v64_v42  ;;  %v35_v49 = vld [vmem:[%s796_s1 + $0x58] sm:$0xff]  ;;  %v21_v50 = vld [vmem:[%s797_s0 + $0x8] sm:$0xff]  ;;  %v482_v51 = vpack.c.bf16 %v51_v45, %v50_v44  ;;  %v66_v52 = vld [vmem:[%s796_s1 + $0x150] sm:$0xff]  ;;  %v240_v44 = vlaneseq }
   0xd   :  { %473 = vmatpush3.bf16.msra.mxu0 %v472_v28  ;;  %v67_v53 = vld [vmem:[%s796_s1 + $0x158] sm:$0xff]  ;;  %v52_v55 = vld [vmem:[%s796_s1 + $0xe0] sm:$0xff]  ;;  %v53_v56 = vld [vmem:[%s796_s1 + $0xe8] sm:$0xff]  ;;  %149 = vmatprep.mubr.f32.mxu0 %v21_v50  ;;  %v484_v57 = vpack.c.bf16 %v35_v49, %v34_v48 }
   0xe   :  { %502 = vmatpush1.bf16.msra.mxu1 %v501_v29  ;;  %475 = vmatprep.subr.bf16.mxu0 %v474_v31  ;;  %v23_v54 = vld [vmem:[%s797_s0 + $0x18] sm:$0xff]  ;;  %v510_v58 = vpack.c.bf16 %v67_v53, %v66_v52  ;;  %v36_v59 = vld [vmem:[%s796_s1 + $0x60] sm:$0xff]  ;;  %v486_v60 = vpack.c.bf16 %v53_v56, %v52_v55  ;;  %v37_v61 = vld [vmem:[%s796_s1 + $0x68] sm:$0xff]  ;;  %v241_v45 = vshrl.u32 %v240_v44, 7 }
   0xf   :  { %503 = vmatprep.subr.bf16.mxu1 %v538_v2  ;;  %408 = vmatprep.mubr.msk.f32.mxu1 %vm81_vm0, %v23_v54  ;;  %v68_v62 = vld [vmem:[%s796_s1 + $0x160] sm:$0xff]  ;;  %v69_v63 = vld [vmem:[%s796_s1 + $0x168] sm:$0xff]  ;;  %v54_v0 = vld [vmem:[%s796_s1 + $0xf0] sm:$0xff]  ;;  %v488_v3 = vpack.c.bf16 %v37_v61, %v36_v59 }
  0x10   :  { %v55_v1 = vld [vmem:[%s796_s1 + $0xf8] sm:$0xff]  ;;  %v513_v4 = vpack.c.bf16 %v69_v63, %v68_v62  ;;  %v38_v5 = vld [vmem:[%s796_s1 + $0x70] sm:$0xff]  ;;  %v72_v12 = vld [vmem:[%s796_s1 + $0x180] sm:$0xff]  ;;  %v246_v49 = vsub.s32 1, %v241_v45 }
  0x11   :  { %477 = vmatpush3.bf16.msra.mxu0 %v476_v37  ;;  %v490_v6 = vpack.c.bf16 %v55_v1, %v54_v0  ;;  %v39_v7 = vld [vmem:[%s796_s1 + $0x78] sm:$0xff]  ;;  %v70_v8 = vld [vmem:[%s796_s1 + $0x170] sm:$0xff]  ;;  %v73_v13 = vld [vmem:[%s796_s1 + $0x188] sm:$0xff] }
  0x12   :  { %505 = vmatpush1.bf16.msra.mxu1 %v504_v38  ;;  %479 = vmatprep.subr.bf16.mxu0 %v478_v40  ;;  %v71_v9 = vld [vmem:[%s796_s1 + $0x178] sm:$0xff]  ;;  %v492_v10 = vpack.c.bf16 %v39_v7, %v38_v5  ;;  %v20_v14 = vld [vmem:[%s797_s0] sm:$0xff]  ;;  %v519_v15 = vpack.c.bf16 %v73_v13, %v72_v12  ;;  %v22_v16 = vld [vmem:[%s797_s0 + $0x10] sm:$0xff] }
  0x13   :  { %506 = vmatprep.subr.bf16.mxu1 %v538_v2  ;;  %v516_v11 = vpack.c.bf16 %v71_v9, %v70_v8  ;;  %v227_v17 = vld [vmem:[%s798_s3 + $0x8] sm:$0xff]  ;;  %v230_v18 = vld [vmem:[%s798_s3 + $0x20] sm:$0xff]  ;;  %v229_v21 = vld [vmem:[%s798_s3 + $0x18] sm:$0xff] }
  0x14   :  { %v521_v19 = vpack.c.bf16 %v230_v18, %v227_v17  ;;  %v226_v20 = vld [vmem:[%s798_s3] sm:$0xff]  ;;  %v228_v22 = vld [vmem:[%s798_s3 + $0x10] sm:$0xff]  ;;  %v231_v24 = vld [vmem:[%s798_s3 + $0x28] sm:$0xff] }
  0x15   :  { %481 = vmatpush3.bf16.msra.mxu0 %v480_v46  ;;  %v523_v23 = vpack.c.bf16 %v229_v21, %v226_v20  ;;  %v530_v25 = vpack.c.bf16 %v231_v24, %v228_v22  ;;  %v233_v26 = vld [vmem:[%s798_s3 + $0x38] sm:$0xff]  ;;  %v236_v27 = vld [vmem:[%s798_s3 + $0x50] sm:$0xff]  ;;  %v235_v30 = vld [vmem:[%s798_s3 + $0x48] sm:$0xff]  ;;  %v242_v46 = vsub.s32 0, %v241_v45 }
  0x16   :  { %508 = vmatpush1.bf16.msra.mxu1 %v507_v47  ;;  %483 = vmatprep.subr.bf16.mxu0 %v482_v51  ;;  %v525_v28 = vpack.c.bf16 %v236_v27, %v233_v26  ;;  %v232_v29 = vld [vmem:[%s798_s3 + $0x30] sm:$0xff]  ;;  %v234_v31 = vld [vmem:[%s798_s3 + $0x40] sm:$0xff]  ;;  %v237_v33 = vld [vmem:[%s798_s3 + $0x58] sm:$0xff]  ;;  %v250_v47 = vsub.s32 2, %v241_v45 }
  0x17   :  { %509 = vmatprep.subr.bf16.mxu1 %v538_v2  ;;  %v527_v32 = vpack.c.bf16 %v235_v30, %v232_v29  ;;  %v533_v34 = vpack.c.bf16 %v237_v33, %v234_v31  ;;  %v407_v38 = vld [vmem:[%s799_s2] ss:$0 sm:$0xff] }
  0x18   :  { %v238_v48 = vld [vmem:[%s800_s4] sm:$0x7] }
  0x19   :  { %485 = vmatpush3.bf16.msra.mxu0 %v484_v57  ;;  %v243_v50 = vrot.slane %v238_v48, %v242_v46  ;;  %v251_v51 = vrot.slane %v238_v48, %v250_v47  ;;  %v247_v52 = vrot.slane %v238_v48, %v246_v49 }
  0x1a   :  { %511 = vmatpush1.bf16.msra.mxu1 %v510_v58  ;;  %487 = vmatprep.subr.bf16.mxu0 %v486_v60 }
  0x1b   :  { %512 = vmatprep.subr.bf16.mxu1 %v538_v2 }
  0x1d   :  { %489 = vmatpush3.bf16.msra.mxu0 %v488_v3 }
  0x1e   :  { %514 = vmatpush1.bf16.msra.mxu1 %v513_v4  ;;  %491 = vmatprep.subr.bf16.mxu0 %v490_v6 }
  0x1f   :  { %515 = vmatprep.subr.bf16.mxu1 %v538_v2 }
  0x21   :  { %493 = vmatpush3.bf16.msra.mxu0 %v492_v10 }
  0x22   :  { %517 = vmatpush1.bf16.msra.mxu1 %v516_v11  ;;  %522 = vmatprep.subr.bf16.mxu0 %v521_v19 }
  0x23   :  { %518 = vmatprep.subr.bf16.mxu1 %v538_v2 }
  0x24   :  { %150 = vmatmul.mubr.f32.vlgmr.msra.gmra.mrb[0].mxu0 %v20_v14 }
  0x25   :  { %524 = vmatpush1.bf16.msra.mxu0 %v523_v23  ;;  %323 = vmatprep.mubr.f32.mxu0 %v539_v35 }
  0x26   :  { %520 = vmatpush1.bf16.msra.mxu1 %v519_v15  ;;  %526 = vmatprep.subr.bf16.mxu0 %v525_v28 }
  0x27   :  { %529 = vmatprep.subr.bf16.mxu1 %v538_v2 }
  0x29   :  { %220 = vmatmul.mubr.f32.vlgmr.msra.gmra.mrb[0].mxu1 %v22_v16  ;;  %528 = vmatpush1.bf16.msra.mxu0 %v527_v32 }
  0x2a   :  { %531 = vmatpush3.bf16.msra.mxu1 %v530_v25  ;;  %459 = vmatprep.mubr.msk.f32.mxu1 %vm540_vm1, %v539_v35 }
  0x2b   :  { %532 = vmatprep.subr.bf16.mxu1 %v538_v2 }
  0x2e   :  { %534 = vmatpush3.bf16.msra.mxu1 %v533_v34 }
  0xf7   :  { %v443_v36 = vpop.f32.mrb[0].mxu0 }
  0xf8   :  { %v444_v37 = vpop.f32.mrb[1].mxu0 }
  0xf9   :  { %v445_v2 = vadd.f32 %v444_v37, %v443_v36 }
  0xfb   :  { %v152_v39 = vadd.f32 %v445_v2, %v407_v38 }
  0xfc   :  { %v221_v40 = vpop.f32.mrb[0].mxu1 }
  0xfd   :  { %v223_v41 = vpop.f32.mrb[1].mxu1  ;;  %v222_v42 = vadd.f32 %v221_v40, %v152_v39 }
  0xff   :  { %v225_v43 = vmax.f32 %v222_v42, 0.0 }
 0x101   :  { %409 = vmatmul.mubr.msk.f32.vlgmr.msra.gmra.mrb[2].mxu0 %vm255_vm2, %v225_v43  ;;  %460 = vmatmul.mubr.msk.f32.vlgmr.msra.gmra.mrb[2].mxu1 %vm255_vm2, %v225_v43 }
 0x1d4   :  { %v325_v53 = vpop.f32.mrb[2].mxu0  ;;  %v396_v54 = vpop.f32.mrb[2].mxu1 }
 0x1d5   :  { %v326_v55 = vadd.f32 %v325_v53, %v243_v50  ;;  %v397_v56 = vadd.f32 %v396_v54, %v251_v51  ;;  %v327_v57 = vpop.f32.mrb[3].mxu0  ;;  %v461_v58 = vpop.f32.mrb[3].mxu1 }
 0x1d6   :  { %v328_v59 = vadd.f32 %v327_v57, %v247_v52 }
 0x1d7   :  { %400 = vst [vmem:[%s801_s5] sm:$0xff] %v326_v55  ;;  %402 = vst [vmem:[%s801_s5 + $0x10] sm:$0xff] %v397_v56 }
 0x1d8   :  { %401 = vst [vmem:[%s801_s5 + $0x8] sm:$0xff] %v328_v59 }

// kernel: critic_impala_forward.7
= control target key start
LH: loop header
LB: loop body
LE: loop exit
PB: predicated region body
PF: predicated region fallthrough
CT: control target
= control target key end

     0   :  { %v1344_v3 = vmov 0.0|0.0   ;;  %v1345_v4 = vmov 0.0   ;;  %vm1346_vm0 = vmmov 0   ;;  %vm461_vm1 = vcmask 517120   ;;  %s1912_s1 = inlined_call_operand.vmem [shape: f32[128,384], index: 1, kind: input, shape index: {}]   ;;  %s1913_s3 = inlined_call_operand.vmem [shape: f32[128,128], index: 3, kind: input, shape index: {}]   ;;  %s1914_s5 = inlined_call_operand.vmem [shape: f32[128,64], index: 5, kind: input, shape index: {}]   ;;  %s1915_s2 = inlined_call_operand.vmem [shape: f32[1,384], index: 2, kind: input, shape index: {}]   ;;  %s1916_s0 = inlined_call_operand.vmem [shape: f32[2,2,384], index: 0, kind: input, shape index: {}]   ;;  %s1917_s4 = inlined_call_operand.vmem [shape: f32[1,128], index: 4, kind: input, shape index: {}]   ;;  %s1918_s10 = inlined_call_operand.vmem [shape: f32[2,128], index: 10, kind: output, shape index: {1}]   ;;  %s1919_s8 = inlined_call_operand.<no memory space> [shape: f32[1,1], index: 8, kind: input, shape index: {}]   ;;  %s1920_s6 = inlined_call_operand.vmem [shape: f32[1,64], index: 6, kind: input, shape index: {}]   ;;  %s1921_s7 = inlined_call_operand.vmem [shape: f32[1,64], index: 7, kind: input, shape index: {}]   ;;  %s1922_s9 = inlined_call_operand.vmem [shape: f32[2,128], index: 9, kind: output, shape index: {0}]  }
   0x1   :  { %v38_v0 = vld [vmem:[%s1912_s1 + $0x8] sm:$0xff]  ;;  %v41_v1 = vld [vmem:[%s1912_s1 + $0x20] sm:$0xff]  ;;  %1152 = vmatprep.subr.bf16.mxu1 %v1344_v3  ;;  %166 = vmatprep.mubr.f32.mxu0 %v1345_v4  ;;  %v40_v6 = vld [vmem:[%s1912_s1 + $0x18] sm:$0xff]  ;;  %vm789_vm2 = vcmask 7168   ;;  %vm791_vm3 = vcmask 15360  }
   0x2   :  { %v37_v2 = vld [vmem:[%s1912_s1] sm:$0xff]  ;;  %v1414_v5 = vpack.c.bf16 %v41_v1, %v38_v0  ;;  %v44_v7 = vld [vmem:[%s1912_s1 + $0x38] sm:$0xff]  ;;  %v47_v8 = vld [vmem:[%s1912_s1 + $0x50] sm:$0xff]  ;;  %942 = vmatprep.mubr.msk.f32.mxu1 %vm1346_vm0, %v1345_v4 }
   0x3   :  { %v1427_v9 = vpack.c.bf16 %v40_v6, %v37_v2  ;;  %v1429_v10 = vpack.c.bf16 %v47_v8, %v44_v7  ;;  %v43_v11 = vld [vmem:[%s1912_s1 + $0x30] sm:$0xff]  ;;  %v46_v12 = vld [vmem:[%s1912_s1 + $0x48] sm:$0xff]  ;;  %v53_v14 = vld [vmem:[%s1912_s1 + $0x80] sm:$0xff] }
   0x4   :  { %v50_v13 = vld [vmem:[%s1912_s1 + $0x68] sm:$0xff]  ;;  %1121 = vmatprep.subr.bf16.mxu0 %v1414_v5  ;;  %v1445_v15 = vpack.c.bf16 %v46_v12, %v43_v11  ;;  %v49_v17 = vld [vmem:[%s1912_s1 + $0x60] sm:$0xff]  ;;  %v52_v18 = vld [vmem:[%s1912_s1 + $0x78] sm:$0xff] }
   0x5   :  { %1123 = vmatpush1.bf16.msra.mxu0 %v1427_v9  ;;  %v1448_v16 = vpack.c.bf16 %v53_v14, %v50_v13  ;;  %v56_v19 = vld [vmem:[%s1912_s1 + $0x98] sm:$0xff]  ;;  %v59_v20 = vld [vmem:[%s1912_s1 + $0xb0] sm:$0xff]  ;;  %v42_v22 = vld [vmem:[%s1912_s1 + $0x28] sm:$0xff]  ;;  %v1469_v23 = vpack.c.bf16 %v52_v18, %v49_v17 }
   0x6   :  { %1125 = vmatprep.subr.bf16.mxu0 %v1429_v10  ;;  %v39_v21 = vld [vmem:[%s1912_s1 + $0x10] sm:$0xff]  ;;  %v45_v25 = vld [vmem:[%s1912_s1 + $0x40] sm:$0xff]  ;;  %v1477_v26 = vpack.c.bf16 %v59_v20, %v56_v19  ;;  %v58_v28 = vld [vmem:[%s1912_s1 + $0xa8] sm:$0xff] }
   0x7   :  { %v1471_v24 = vpack.c.bf16 %v42_v22, %v39_v21  ;;  %v55_v27 = vld [vmem:[%s1912_s1 + $0x90] sm:$0xff]  ;;  %v48_v29 = vld [vmem:[%s1912_s1 + $0x58] sm:$0xff]  ;;  %v62_v30 = vld [vmem:[%s1912_s1 + $0xc8] sm:$0xff] }
   0x8   :  { %v65_v31 = vld [vmem:[%s1912_s1 + $0xe0] sm:$0xff]  ;;  %v1495_v32 = vpack.c.bf16 %v48_v29, %v45_v25  ;;  %v51_v33 = vld [vmem:[%s1912_s1 + $0x70] sm:$0xff]  ;;  %v54_v34 = vld [vmem:[%s1912_s1 + $0x88] sm:$0xff]  ;;  %v1505_v35 = vpack.c.bf16 %v58_v28, %v55_v27 }
   0x9   :  { %1127 = vmatpush1.bf16.msra.mxu0 %v1445_v15  ;;  %1154 = vmatpush3.bf16.msra.mxu1 %v1471_v24  ;;  %v1508_v36 = vpack.c.bf16 %v65_v31, %v62_v30  ;;  %v61_v37 = vld [vmem:[%s1912_s1 + $0xc0] sm:$0xff]  ;;  %v64_v38 = vld [vmem:[%s1912_s1 + $0xd8] sm:$0xff]  ;;  %v71_v40 = vld [vmem:[%s1912_s1 + $0x110] sm:$0xff]  ;;  %v1523_v41 = vpack.c.bf16 %v54_v34, %v51_v33 }
   0xa   :  { %1129 = vmatprep.subr.bf16.mxu0 %v1448_v16  ;;  %1155 = vmatprep.subr.bf16.mxu1 %v1344_v3  ;;  %v68_v39 = vld [vmem:[%s1912_s1 + $0xf8] sm:$0xff]  ;;  %v57_v42 = vld [vmem:[%s1912_s1 + $0xa0] sm:$0xff]  ;;  %v1533_v44 = vpack.c.bf16 %v64_v38, %v61_v37  ;;  %v67_v46 = vld [vmem:[%s1912_s1 + $0xf0] sm:$0xff] }
   0xb   :  { %v60_v43 = vld [vmem:[%s1912_s1 + $0xb8] sm:$0xff]  ;;  %v1536_v45 = vpack.c.bf16 %v71_v40, %v68_v39  ;;  %v70_v47 = vld [vmem:[%s1912_s1 + $0x108] sm:$0xff]  ;;  %v77_v49 = vld [vmem:[%s1912_s1 + $0x140] sm:$0xff] }
   0xc   :  { %v74_v48 = vld [vmem:[%s1912_s1 + $0x128] sm:$0xff]  ;;  %v1551_v50 = vpack.c.bf16 %v60_v43, %v57_v42  ;;  %v63_v51 = vld [vmem:[%s1912_s1 + $0xd0] sm:$0xff]  ;;  %v1561_v53 = vpack.c.bf16 %v70_v47, %v67_v46  ;;  %v73_v55 = vld [vmem:[%s1912_s1 + $0x120] sm:$0xff] }
   0xd   :  { %1131 = vmatpush1.bf16.msra.mxu0 %v1469_v23  ;;  %1157 = vmatpush3.bf16.msra.mxu1 %v1495_v32  ;;  %v66_v52 = vld [vmem:[%s1912_s1 + $0xe8] sm:$0xff]  ;;  %v1564_v54 = vpack.c.bf16 %v77_v49, %v74_v48  ;;  %v76_v56 = vld [vmem:[%s1912_s1 + $0x138] sm:$0xff]  ;;  %v83_v58 = vld [vmem:[%s1912_s1 + $0x170] sm:$0xff] }
   0xe   :  { %1133 = vmatprep.subr.bf16.mxu0 %v1477_v26  ;;  %1158 = vmatprep.subr.bf16.mxu1 %v1344_v3  ;;  %v80_v57 = vld [vmem:[%s1912_s1 + $0x158] sm:$0xff]  ;;  %v1579_v59 = vpack.c.bf16 %v66_v52, %v63_v51  ;;  %v69_v60 = vld [vmem:[%s1912_s1 + $0x100] sm:$0xff]  ;;  %v1589_v62 = vpack.c.bf16 %v76_v56, %v73_v55  ;;  %v79_v0 = vld [vmem:[%s1912_s1 + $0x150] sm:$0xff] }
   0xf   :  { %v72_v61 = vld [vmem:[%s1912_s1 + $0x118] sm:$0xff]  ;;  %v1592_v63 = vpack.c.bf16 %v83_v58, %v80_v57  ;;  %v82_v1 = vld [vmem:[%s1912_s1 + $0x168] sm:$0xff]  ;;  %v75_v6 = vld [vmem:[%s1912_s1 + $0x130] sm:$0xff] }
  0x10   :  { %v1601_v2 = vpack.c.bf16 %v72_v61, %v69_v60  ;;  %v78_v7 = vld [vmem:[%s1912_s1 + $0x148] sm:$0xff]  ;;  %v1611_v8 = vpack.c.bf16 %v82_v1, %v79_v0  ;;  %v81_v12 = vld [vmem:[%s1912_s1 + $0x160] sm:$0xff]  ;;  %v84_v13 = vld [vmem:[%s1912_s1 + $0x178] sm:$0xff] }
  0x11   :  { %1135 = vmatpush1.bf16.msra.mxu0 %v1505_v35  ;;  %1160 = vmatpush3.bf16.msra.mxu1 %v1523_v41  ;;  %v1615_v11 = vpack.c.bf16 %v78_v7, %v75_v6  ;;  %v1627_v14 = vpack.c.bf16 %v84_v13, %v81_v12  ;;  %v265_v17 = vld [vmem:[%s1913_s3] sm:$0xff]  ;;  %v266_v18 = vld [vmem:[%s1913_s3 + $0x8] sm:$0xff]  ;;  %v267_v20 = vld [vmem:[%s1913_s3 + $0x10] sm:$0xff] }
  0x12   :  { %1137 = vmatprep.subr.bf16.mxu0 %v1508_v36  ;;  %1161 = vmatprep.subr.bf16.mxu1 %v1344_v3  ;;  %v1644_v19 = vpack.c.bf16 %v266_v18, %v265_v17  ;;  %v268_v21 = vld [vmem:[%s1913_s3 + $0x18] sm:$0xff]  ;;  %v269_v25 = vld [vmem:[%s1913_s3 + $0x20] sm:$0xff]  ;;  %v270_v27 = vld [vmem:[%s1913_s3 + $0x28] sm:$0xff] }
  0x13   :  { %v1654_v22 = vpack.c.bf16 %v268_v21, %v267_v20  ;;  %v1664_v28 = vpack.c.bf16 %v270_v27, %v269_v25  ;;  %v271_v29 = vld [vmem:[%s1913_s3 + $0x30] sm:$0xff]  ;;  %v272_v30 = vld [vmem:[%s1913_s3 + $0x38] sm:$0xff]  ;;  %v273_v33 = vld [vmem:[%s1913_s3 + $0x40] sm:$0xff] }
  0x14   :  { %v1674_v31 = vpack.c.bf16 %v272_v30, %v271_v29  ;;  %v274_v34 = vld [vmem:[%s1913_s3 + $0x48] sm:$0xff]  ;;  %v275_v38 = vld [vmem:[%s1913_s3 + $0x50] sm:$0xff]  ;;  %v276_v39 = vld [vmem:[%s1913_s3 + $0x58] sm:$0xff]  ;;  %v87_v29 = vlaneseq }
  0x15   :  { %1139 = vmatpush1.bf16.msra.mxu0 %v1533_v44  ;;  %1163 = vmatpush3.bf16.msra.mxu1 %v1551_v50  ;;  %v1684_v37 = vpack.c.bf16 %v274_v34, %v273_v33  ;;  %v277_v40 = vld [vmem:[%s1913_s3 + $0x60] sm:$0xff]  ;;  %v1697_v42 = vpack.c.bf16 %v276_v39, %v275_v38  ;;  %v278_v43 = vld [vmem:[%s1913_s3 + $0x68] sm:$0xff]  ;;  %v279_v47 = vld [vmem:[%s1913_s3 + $0x70] sm:$0xff] }
  0x16   :  { %1141 = vmatprep.subr.bf16.mxu0 %v1536_v45  ;;  %1164 = vmatprep.subr.bf16.mxu1 %v1344_v3  ;;  %v1703_v46 = vpack.c.bf16 %v278_v43, %v277_v40  ;;  %v280_v48 = vld [vmem:[%s1913_s3 + $0x78] sm:$0xff]  ;;  %v359_v51 = vld [vmem:[%s1914_s5] sm:$0xff]  ;;  %v360_v52 = vld [vmem:[%s1914_s5 + $0x8] sm:$0xff]  ;;  %v88_v30 = vshrl.u32 %v87_v29, 7 }
  0x17   :  { %v1713_v49 = vpack.c.bf16 %v280_v48, %v279_v47  ;;  %v361_v55 = vld [vmem:[%s1914_s5 + $0x10] sm:$0xff]  ;;  %v1727_v56 = vpack.c.bf16 %v360_v52, %v359_v51  ;;  %v362_v57 = vld [vmem:[%s1914_s5 + $0x18] sm:$0xff]  ;;  %v363_v58 = vld [vmem:[%s1914_s5 + $0x20] sm:$0xff] }
  0x18   :  { %v364_v60 = vld [vmem:[%s1914_s5 + $0x28] sm:$0xff]  ;;  %v365_v0 = vld [vmem:[%s1914_s5 + $0x30] sm:$0xff]  ;;  %v366_v1 = vld [vmem:[%s1914_s5 + $0x38] sm:$0xff]  ;;  %v89_v33 = vsub.s32 0, %v88_v30  ;;  %v93_v38 = vsub.s32 1, %v88_v30 }
  0x19   :  { %1143 = vmatpush1.bf16.msra.mxu0 %v1561_v53  ;;  %1166 = vmatpush3.bf16.msra.mxu1 %v1579_v59  ;;  %v1743_v61 = vpack.c.bf16 %v364_v60, %v363_v58  ;;  %v1753_v6 = vpack.c.bf16 %v366_v1, %v365_v0  ;;  %v367_v7 = vld [vmem:[%s1914_s5 + $0x40] sm:$0xff]  ;;  %v368_v12 = vld [vmem:[%s1914_s5 + $0x48] sm:$0xff]  ;;  %v369_v17 = vld [vmem:[%s1914_s5 + $0x50] sm:$0xff] }
  0x1a   :  { %1145 = vmatprep.subr.bf16.mxu0 %v1564_v54  ;;  %1167 = vmatprep.subr.bf16.mxu1 %v1344_v3  ;;  %v1763_v13 = vpack.c.bf16 %v368_v12, %v367_v7  ;;  %v370_v18 = vld [vmem:[%s1914_s5 + $0x58] sm:$0xff]  ;;  %v371_v21 = vld [vmem:[%s1914_s5 + $0x60] sm:$0xff]  ;;  %v372_v25 = vld [vmem:[%s1914_s5 + $0x68] sm:$0xff]  ;;  %v97_v12 = vsub.s32 2, %v88_v30 }
  0x1b   :  { %v1773_v20 = vpack.c.bf16 %v370_v18, %v369_v17  ;;  %v1783_v27 = vpack.c.bf16 %v372_v25, %v371_v21  ;;  %v85_v34 = vld [vmem:[%s1915_s2] sm:$0x7] }
  0x1c   :  { %v1791_v39 = vrot.slane %v85_v34, %v89_v33  ;;  %v1793_v40 = vrot.slane %v85_v34, %v93_v38  ;;  %v36_v43 = vld [vmem:[%s1916_s0] sm:$0x3f]  ;;  %v1800_v17 = vrot.slane %v85_v34, %v97_v12 }
  0x1d   :  { %1147 = vmatpush1.bf16.msra.mxu0 %v1589_v62  ;;  %1169 = vmatpush3.bf16.msra.mxu1 %v1601_v2  ;;  %v257_v33 = vrot.slane %v36_v43, 4 }
  0x1e   :  { %1149 = vmatprep.subr.bf16.mxu0 %v1592_v63  ;;  %1170 = vmatprep.subr.bf16.mxu1 %v1344_v3 }
  0x21   :  { %1151 = vmatpush1.bf16.msra.mxu0 %v1611_v8  ;;  %1172 = vmatpush3.bf16.msra.mxu1 %v1615_v11 }
  0x22   :  { %1176 = vmatprep.subr.bf16.mxu0 %v1344_v3  ;;  %1173 = vmatprep.subr.bf16.mxu1 %v1344_v3 }
  0x24   :  { %167 = vmatmul.mubr.f32.vlgmr.msra.gmra.mrb[0].mxu0 %v1345_v4 }
  0x25   :  { %977 = vmatprep.mubr.msk.f32.mxu0 %vm1346_vm0, %v1345_v4  ;;  %1175 = vmatpush3.bf16.msra.mxu1 %v1627_v14 }
  0x26   :  { %1200 = vmatprep.subr.bf16.mxu1 %v1344_v3  ;;  %1178 = vmatpush3.bf16.msra.mxu0 %v1644_v19 }
  0x27   :  { %1179 = vmatprep.subr.bf16.mxu0 %v1344_v3 }
  0x28   :  { %943 = vmatmul.mubr.f32.vlgmr.msra.gmra.mrb[0].mxu1 %v1345_v4 }
  0x29   :  { %1012 = vmatprep.mubr.msk.f32.mxu1 %vm1346_vm0, %v1345_v4  ;;  %1202 = vmatpush3.bf16.msra.mxu1 %v1727_v56 }
  0x2a   :  { %1181 = vmatpush3.bf16.msra.mxu0 %v1654_v22  ;;  %1203 = vmatprep.subr.bf16.mxu1 %v1344_v3 }
  0x2b   :  { %1182 = vmatprep.subr.bf16.mxu0 %v1344_v3 }
  0x2e   :  { %1184 = vmatpush3.bf16.msra.mxu0 %v1664_v28 }
  0x2f   :  { %1185 = vmatprep.subr.bf16.mxu0 %v1344_v3 }
  0x32   :  { %1187 = vmatpush3.bf16.msra.mxu0 %v1674_v31 }
  0x33   :  { %1188 = vmatprep.subr.bf16.mxu0 %v1344_v3 }
  0x36   :  { %1190 = vmatpush3.bf16.msra.mxu0 %v1684_v37 }
  0x37   :  { %1191 = vmatprep.subr.bf16.mxu0 %v1344_v3 }
  0x3a   :  { %1193 = vmatpush3.bf16.msra.mxu0 %v1697_v42 }
  0x3b   :  { %1194 = vmatprep.subr.bf16.mxu0 %v1344_v3 }
  0x3e   :  { %1196 = vmatpush3.bf16.msra.mxu0 %v1703_v46 }
  0x3f   :  { %1197 = vmatprep.subr.bf16.mxu0 %v1344_v3 }
  0x42   :  { %1199 = vmatpush3.bf16.msra.mxu0 %v1713_v49 }
  0x43   :  { %1225 = vmatprep.subr.bf16.mxu0 %v1414_v5  ;;  %v1733_v5 = vpack.c.bf16 %v362_v57, %v361_v55  ;;  %v249_v55 = vrot.slane %v36_v43, 2 }
  0x45   :  { %1205 = vmatpush3.bf16.msra.mxu1 %v1733_v5 }
  0x46   :  { %1206 = vmatprep.subr.bf16.mxu1 %v1344_v3 }
  0x49   :  { %1208 = vmatpush3.bf16.msra.mxu1 %v1743_v61 }
  0x4a   :  { %1209 = vmatprep.subr.bf16.mxu1 %v1344_v3 }
  0x4d   :  { %1211 = vmatpush3.bf16.msra.mxu1 %v1753_v6 }
  0x4e   :  { %1212 = vmatprep.subr.bf16.mxu1 %v1344_v3 }
  0x51   :  { %1214 = vmatpush3.bf16.msra.mxu1 %v1763_v13 }
  0x52   :  { %1215 = vmatprep.subr.bf16.mxu1 %v1344_v3 }
  0x55   :  { %1217 = vmatpush3.bf16.msra.mxu1 %v1773_v20 }
  0x56   :  { %1218 = vmatprep.subr.bf16.mxu1 %v1344_v3 }
  0x59   :  { %1220 = vmatpush3.bf16.msra.mxu1 %v1783_v27 }
  0x5a   :  { %1221 = vmatprep.subr.bf16.mxu1 %v1344_v3 }
  0xf7   :  { %v168_v47 = vpop.f32.mrb[0].mxu0 }
  0xf8   :  { %v169_v48 = vadd.f32 %v168_v47, %v1791_v39  ;;  %v170_v51 = vpop.f32.mrb[1].mxu0 }
  0xf9   :  { %v171_v52 = vadd.f32 %v170_v51, %v1793_v40 }
  0xfa   :  { %v243_v57 = vadd.f32 %v169_v48, %v36_v43 }
  0xfb   :  { %v251_v60 = vadd.f32 %v249_v55, %v171_v52  ;;  %v239_v0 = vpop.f32.mrb[0].mxu1 }
  0xfc   :  { %v244_v58 = vmul.f32 0.5, %v243_v57  ;;  %v944_v1 = vpop.f32.mrb[1].mxu1  ;;  %v240_v21 = vadd.f32 %v239_v0, %v1800_v17 }
  0xfd   :  { %v252_v7 = vmul.f32 0.5, %v251_v60 }
  0xfe   :  { %1332 = vtanh.f32 %v244_v58 }
  0xff   :  { %1334 = vtanh.f32 %v252_v7 }
 0x108   :  { %v1333_v18 = vpop.eup %1332 }
 0x109   :  { %v246_v25 = vmul.f32 0.5, %v1333_v18  ;;  %v1335_v47 = vpop.eup %1334  ;;  %v805_v18 = vld [vmem:[%s1921_s7] ss:$0 sm:$0xff] }
 0x10a   :  { %v254_v48 = vmul.f32 0.5, %v1335_v47 }
 0x10b   :  { %v247_v29 = vadd.f32 0.5, %v246_v25 }
 0x10c   :  { %v255_v52 = vadd.f32 0.5, %v254_v48 }
 0x10d   :  { %v256_v38 = vmul.f32 %v247_v29, %v240_v21 }
 0x10e   :  { %v261_v55 = vsub.f32 1.0, %v255_v52  ;;  %v263_v58 = vmul.f32 0.0, %v255_v52 }
 0x10f   :  { %v259_v51 = vadd.f32 %v257_v33, %v256_v38 }
 0x111   :  { %1336 = vtanh.f32 %v259_v51 }
 0x11b   :  { %v1337_v57 = vpop.eup %1336 }
 0x11c   :  { %v262_v60 = vmul.f32 %v1337_v57, %v261_v55 }
 0x11e   :  { %v1803_v30 = vadd.f32 %v263_v58, %v262_v60 }
 0x120   :  { %978 = vmatmul.mubr.f32.vlgmr.msra.gmra.mrb[2].mxu0 %v1803_v30 }
 0x121   :  { %1227 = vmatpush1.bf16.msra.mxu0 %v1427_v9  ;;  %539 = vmatprep.mubr.f32.mxu0 %v1345_v4  ;;  %v373_v9 = vld [vmem:[%s1914_s5 + $0x70] sm:$0xff] }
 0x122   :  { %1229 = vmatprep.subr.bf16.mxu0 %v1429_v10  ;;  %v374_v10 = vld [vmem:[%s1914_s5 + $0x78] sm:$0xff] }
 0x125   :  { %1231 = vmatpush1.bf16.msra.mxu0 %v1445_v15  ;;  %v1222_v15 = vpack.c.bf16 %v374_v10, %v373_v9 }
 0x126   :  { %1233 = vmatprep.subr.bf16.mxu0 %v1448_v16  ;;  %v1851_v16 = vld [vmem:[%s1917_s4] ss:$0 sm:$0xff] }
 0x127   :  { %1223 = vmatpush3.bf16.msra.mxu1 %v1222_v15 }
 0x128   :  { %1256 = vmatprep.subr.bf16.mxu1 %v1344_v3 }
 0x129   :  { %1235 = vmatpush1.bf16.msra.mxu0 %v1469_v23 }
 0x12a   :  { %1237 = vmatprep.subr.bf16.mxu0 %v1477_v26 }
 0x12d   :  { %1239 = vmatpush1.bf16.msra.mxu0 %v1505_v35 }
 0x12e   :  { %1241 = vmatprep.subr.bf16.mxu0 %v1508_v36 }
 0x131   :  { %1243 = vmatpush1.bf16.msra.mxu0 %v1533_v44 }
 0x132   :  { %1245 = vmatprep.subr.bf16.mxu0 %v1536_v45  ;;  %v807_v45 = vld [vmem:[%s1916_s0 + $0x6] sm:$0x3f] }
 0x135   :  { %1247 = vmatpush1.bf16.msra.mxu0 %v1561_v53 }
 0x136   :  { %1249 = vmatprep.subr.bf16.mxu0 %v1564_v54 }
 0x139   :  { %1251 = vmatpush1.bf16.msra.mxu0 %v1589_v62 }
 0x13a   :  { %1253 = vmatprep.subr.bf16.mxu0 %v1592_v63 }
 0x13d   :  { %1255 = vmatpush1.bf16.msra.mxu0 %v1611_v8 }
 0x13e   :  { %1280 = vmatprep.subr.bf16.mxu0 %v1344_v3 }
 0x140   :  { %540 = vmatmul.mubr.f32.vlgmr.msra.gmra.mrb[4].mxu0 %v1803_v30 }
 0x141   :  { %1282 = vmatpush3.bf16.msra.mxu0 %v1644_v19  ;;  %1082 = vmatprep.mubr.msk.f32.mxu0 %vm1346_vm0, %v1345_v4  ;;  %v630_v19 = vrot.slane %v807_v45, 4 }
 0x142   :  { %1283 = vmatprep.subr.bf16.mxu0 %v1344_v3 }
 0x145   :  { %1285 = vmatpush3.bf16.msra.mxu0 %v1654_v22 }
 0x146   :  { %1286 = vmatprep.subr.bf16.mxu0 %v1344_v3 }
 0x149   :  { %1288 = vmatpush3.bf16.msra.mxu0 %v1664_v28 }
 0x14a   :  { %1289 = vmatprep.subr.bf16.mxu0 %v1344_v3 }
 0x14d   :  { %1291 = vmatpush3.bf16.msra.mxu0 %v1674_v31 }
 0x14e   :  { %1292 = vmatprep.subr.bf16.mxu0 %v1344_v3 }
 0x151   :  { %1294 = vmatpush3.bf16.msra.mxu0 %v1684_v37 }
 0x152   :  { %1295 = vmatprep.subr.bf16.mxu0 %v1344_v3 }
 0x155   :  { %1297 = vmatpush3.bf16.msra.mxu0 %v1697_v42 }
 0x156   :  { %1298 = vmatprep.subr.bf16.mxu0 %v1344_v3 }
 0x159   :  { %1300 = vmatpush3.bf16.msra.mxu0 %v1703_v46 }
 0x15a   :  { %1301 = vmatprep.subr.bf16.mxu0 %v1344_v3 }
 0x15d   :  { %1303 = vmatpush3.bf16.msra.mxu0 %v1713_v49 }
 0x1f3   :  { %v354_v23 = vpop.f32.mrb[2].mxu0 }
 0x1f4   :  { %v355_v26 = vadd.f32 %v1851_v16, %v354_v23  ;;  %v979_v35 = vpop.f32.mrb[3].mxu0 }
 0x1f6   :  { %v358_v36 = vmax.f32 %v355_v26, 0.0 }
 0x1f8   :  { %1013 = vmatmul.mubr.f32.vlgmr.msra.gmra.mrb[2].mxu1 %v358_v36 }
 0x1f9   :  { %1258 = vmatpush3.bf16.msra.mxu1 %v1471_v24  ;;  %1047 = vmatprep.mubr.msk.f32.mxu1 %vm1346_vm0, %v1345_v4 }
 0x1fa   :  { %1259 = vmatprep.subr.bf16.mxu1 %v1344_v3 }
 0x1fd   :  { %1261 = vmatpush3.bf16.msra.mxu1 %v1495_v32 }
 0x1fe   :  { %1262 = vmatprep.subr.bf16.mxu1 %v1344_v3 }
 0x201   :  { %1264 = vmatpush3.bf16.msra.mxu1 %v1523_v41 }
 0x202   :  { %1265 = vmatprep.subr.bf16.mxu1 %v1344_v3 }
 0x205   :  { %1267 = vmatpush3.bf16.msra.mxu1 %v1551_v50 }
 0x206   :  { %1268 = vmatprep.subr.bf16.mxu1 %v1344_v3 }
 0x209   :  { %1270 = vmatpush3.bf16.msra.mxu1 %v1579_v59  ;;  %v622_v59 = vrot.slane %v807_v45, 2 }
 0x20a   :  { %1271 = vmatprep.subr.bf16.mxu1 %v1344_v3 }
 0x20d   :  { %1273 = vmatpush3.bf16.msra.mxu1 %v1601_v2 }
 0x20e   :  { %1274 = vmatprep.subr.bf16.mxu1 %v1344_v3 }
 0x211   :  { %1276 = vmatpush3.bf16.msra.mxu1 %v1615_v11 }
 0x212   :  { %1277 = vmatprep.subr.bf16.mxu1 %v1344_v3 }
 0x213   :  { %v541_v24 = vpop.f32.mrb[4].mxu0 }
 0x214   :  { %v543_v32 = vpop.f32.mrb[5].mxu0  ;;  %v542_v44 = vadd.f32 %v541_v24, %v1791_v39  ;;  %v16_v39 = vstv %s1919_s8 }
 0x215   :  { %1279 = vmatpush3.bf16.msra.mxu1 %v1627_v14  ;;  %v544_v54 = vadd.f32 %v543_v32, %v1793_v40  ;;  %17 = vst [vmem:[#allocation2] sm:$0x1] %v16_v39  ;;  %v804_v40 = vld [vmem:[%s1920_s6] ss:$0 sm:$0xff]  ;;  %s1347_s6 = smov 1  }
 0x216   :  { %1304 = vmatprep.subr.bf16.mxu1 %v1344_v3  ;;  %v616_v50 = vadd.f32 %v807_v45, %v542_v44 }
 0x217   :  { %v624_v62 = vadd.f32 %v622_v59, %v544_v54 }
 0x218   :  { %1048 = vmatmul.mubr.f32.vlgmr.msra.gmra.mrb[4].mxu1 %v1803_v30  ;;  %v617_v53 = vmul.f32 0.5, %v616_v50 }
 0x219   :  { %1306 = vmatpush3.bf16.msra.mxu1 %v1727_v56  ;;  %1117 = vmatprep.mubr.msk.f32.mxu1 %vm1346_vm0, %v1345_v4  ;;  %v625_v63 = vmul.f32 0.5, %v624_v62 }
 0x21a   :  { %1307 = vmatprep.subr.bf16.mxu1 %v1344_v3  ;;  %1338 = vtanh.f32 %v617_v53 }
 0x21b   :  { %1340 = vtanh.f32 %v625_v63 }
 0x21c   :  { %v806_v38 = vld [vmem:[#allocation2] ss:$0 sm:$0xff] }
 0x21d   :  { %1309 = vmatpush3.bf16.msra.mxu1 %v1733_v5 }
 0x21e   :  { %1310 = vmatprep.subr.bf16.mxu1 %v1344_v3 }
 0x221   :  { %1312 = vmatpush3.bf16.msra.mxu1 %v1743_v61 }
 0x222   :  { %1313 = vmatprep.subr.bf16.mxu1 %v1344_v3 }
 0x224   :  { %v1339_v2 = vpop.eup %1338 }
 0x225   :  { %1315 = vmatpush3.bf16.msra.mxu1 %v1753_v6  ;;  %v1341_v31 = vpop.eup %1340 }
 0x226   :  { %1316 = vmatprep.subr.bf16.mxu1 %v1344_v3  ;;  %v627_v42 = vmul.f32 0.5, %v1341_v31 }
 0x228   :  { %v628_v46 = vadd.f32 0.5, %v627_v42 }
 0x229   :  { %1318 = vmatpush3.bf16.msra.mxu1 %v1763_v13 }
 0x22a   :  { %1319 = vmatprep.subr.bf16.mxu1 %v1344_v3  ;;  %v634_v49 = vsub.f32 1.0, %v628_v46  ;;  %v636_v5 = vmul.f32 %v628_v46, %v1803_v30 }
 0x22d   :  { %1321 = vmatpush3.bf16.msra.mxu1 %v1773_v20 }
 0x22e   :  { %1322 = vmatprep.subr.bf16.mxu1 %v1344_v3 }
 0x231   :  { %1324 = vmatpush3.bf16.msra.mxu1 %v1783_v27 }
 0x232   :  { %1325 = vmatprep.subr.bf16.mxu1 %v1344_v3  ;;  %v619_v3 = vmul.f32 0.5, %v1339_v2 }
 0x234   :  { %v620_v14 = vadd.f32 0.5, %v619_v3 }
 0x235   :  { %1327 = vmatpush3.bf16.msra.mxu1 %v1222_v15 }
 0x2cb   :  { %v448_v4 = vpop.f32.mrb[2].mxu1 }
 0x2cc   :  { %v1014_v41 = vpop.f32.mrb[3].mxu1  ;;  %v449_v43 = vadd.f32 %v804_v40, %v448_v4 }
 0x2ce   :  { %v452_v12 = vmax.f32 %v449_v43, 0.0 }
 0x2d0   :  { %v460_v29 = vmul.f32 %v805_v18, %v452_v12 }
 0x2d2   :  { %v462_v33 = vsel %vm461_vm1, %v460_v29, 0.0 }
 0x2eb   :  { %v612_v8 = vpop.f32.mrb[4].mxu1 }
 0x2ec   :  { %v613_v11 = vadd.f32 %v612_v8, %v1800_v17  ;;  %v1049_v22 = vpop.f32.mrb[5].mxu1 }
 0x2ee   :  { %v629_v28 = vmul.f32 %v620_v14, %v613_v11 }
 0x2f0   :  { %v632_v37 = vadd.f32 %v630_v19, %v629_v28 }
 0x2f2   :  { %1342 = vtanh.f32 %v632_v37 }
 0x2fc   :  { %v1343_v56 = vpop.eup %1342 }
 0x2fd   :  { %v635_v61 = vmul.f32 %v1343_v56, %v634_v49 }
 0x2ff   :  { %v637_v6 = vadd.f32 %v636_v5, %v635_v61 }
 0x301   :  { %1083 = vmatmul.mubr.f32.vlgmr.msra.gmra.mrb[6].mxu0 %v637_v6  ;;  %794 = vst [vmem:[%s1918_s10] sm:$0x3] %v637_v6 }
 0x3d4   :  { %v704_v13 = vpop.f32.mrb[6].mxu0 }
 0x3d5   :  { %v705_v20 = vadd.f32 %v1851_v16, %v704_v13  ;;  %v1084_v27 = vpop.f32.mrb[7].mxu0 }
 0x3d7   :  { %v708_v34 = vmax.f32 %v705_v20, 0.0 }
 0x3d9   :  { %1118 = vmatmul.mubr.f32.vlgmr.msra.gmra.mrb[6].mxu1 %v708_v34 }
 0x4ac   :  { %v775_v0 = vpop.f32.mrb[6].mxu1 }
 0x4ad   :  { %v776_v1 = vadd.f32 %v804_v40, %v775_v0  ;;  %v1119_v7 = vpop.f32.mrb[7].mxu1 }
 0x4af   :  { %v779_v17 = vmax.f32 %v776_v1, 0.0 }
 0x4b1   :  { %v780_v21 = vmul.f32 %v805_v18, %v779_v17 }
 0x4b3   :  { %v781_v25 = vsel %vm461_vm1, %v780_v21, 0.0 }
 0x4b4   :  { %782 = vadd.xlane.f32.xlu0 %v781_v25 }
 0x4b8   :  { %463 = vadd.xlane.f32.xlu0 %v462_v33 }
 0x541   :  { %v783_v47 = vpop.xlane.xlu0 %782 }
 0x542   :  { %v784_v51 = vadd.f32 %v806_v38, %v783_v47 }
 0x544   :  { %786 = vrot.lane.b32.xlu1 %v784_v51, %s1347_s6 }
 0x545   :  { %v464_v48 = vpop.xlane.xlu0 %463 }
 0x546   :  { %v472_v52 = vadd.f32 %v806_v38, %v464_v48 }
 0x5b6   :  { %v787_v55 = vpop.permute.xlu1 %786 }
 0x5b7   :  { %v790_v57 = vsel %vm789_vm2, %v472_v52, %v787_v55 }
 0x5b8   :  { %v792_v58 = vsel %vm791_vm3, %v790_v57, 0.0 }
 0x5b9   :  { %793 = vst [vmem:[%s1922_s9] sm:$0x3] %v792_v58 }

</bundles_post_ra>
